<compile_context>
chip_gen: v6e
topology: v6e:2x2x1
jax: 0.10.0
libtpu: 0.0.40
codegen_flags: <defaults>
</compile_context>

<pallas_src>
import functools

import jax
import jax.numpy as jnp
from jax.experimental import pallas as pl
from jax.experimental.pallas import tpu as pltpu


# ----------------------------------------------------------------------------
# Single fused kernel: L x (dynamic adjacency + GCN + causal dilated conv +
# residual) followed by the attention mechanism.
# ----------------------------------------------------------------------------
def _fused_stgcn_kernel(x_ref, mask_ref, amte_ref, bT_ref, gcn_wT_ref,
                        gcn_b_ref, conv_wT_ref, conv_b_ref, wa_ref, v_ref,
                        ba_ref, out_ref, gpad_ref,
                        *, T, N, K, dilations, alpha, pad_rows):
    f32 = jnp.float32
    bf16 = jnp.bfloat16
    TN = T * N
    D = x_ref.shape[1]

    # Zero the left-padding region of the causal-conv scratch once; every
    # layer rewrites rows >= pad_rows, the pad rows stay zero.
    if pad_rows > 0:
        gpad_ref[0:pad_rows, :] = jnp.zeros((pad_rows, D), f32)

    # Loop-invariant loads (hoisted out of the layer loop).
    blk = mask_ref[...]                       # (TN, TN) block-diagonal 0/1 mask
    bT = bT_ref[...]                          # (D, D) bf16, = B^T
    emb = x_ref[...]                          # (TN, D) f32, time-major node slab
    res_list = []

    for li, dil in enumerate(dilations):
        emb_bf = emb.astype(bf16)

        # ---- scores for ALL T time steps in one shot ----------------------
        # lb[b] = x_last[b] @ B^T, tiled T times along rows so that
        # st[(t,b), (t,a)] = x_t[a] @ B @ x_last[b]^T  (transposed scores).
        xlast = emb_bf[(T - 1) * N:, :]                                  # (N, D)
        lb = jnp.dot(xlast, bT, preferred_element_type=f32)              # (N, D)
        lb_t = jnp.concatenate([lb] * T, axis=0).astype(bf16)            # (TN, D)
        st = jax.lax.dot_general(lb_t, emb_bf, (((1,), (1,)), ((), ())),
                                 preferred_element_type=f32)             # (TN, TN)
        st = jnp.maximum(st, 0.0) * blk               # relu; off-block -> 0

        # Column softmax of the original adjacency == row softmax of st.
        m = jnp.max(st, axis=-1, keepdims=True)
        e = jnp.exp(st - m) * blk
        dyn = e / jnp.sum(e, axis=-1, keepdims=True)  # rows of adj^T, off-blk 0

        if li == 0:                                   # static-MTE blend (layer 0)
            adjT = amte_ref[...] + (1.0 - alpha) * dyn
        else:
            adjT = dyn

        # ---- symmetric degree normalisation + dense GCNConv aggregation ---
        deg = jnp.sum(adjT, axis=-1, keepdims=True)                       # (TN, 1)
        dinv = jnp.where(deg > 0.0,
                         jax.lax.rsqrt(jnp.maximum(deg, 1e-12)), 0.0)
        xw = jnp.dot(emb_bf, gcn_wT_ref[li], preferred_element_type=f32)  # (TN, D)
        agg = jnp.dot(adjT.astype(bf16), (xw * dinv).astype(bf16),
                      preferred_element_type=f32)                         # (TN, D)
        g = jnp.maximum(agg * dinv + gcn_b_ref[li], 0.0)
        gpad_ref[pad_rows:pad_rows + TN, :] = g        # one slab store / layer

        # ---- causal dilated Conv1d over time, batched over all T ----------
        acc = None
        for k in range(K):                             # static unroll over taps
            start = pad_rows - (K - 1 - k) * dil * N   # static, >= 0
            src = gpad_ref[start:start + TN, :].astype(bf16)
            c = jnp.dot(src, conv_wT_ref[li, k], preferred_element_type=f32)
            acc = c if acc is None else acc + c
        conv = jnp.maximum(acc + conv_b_ref[li], 0.0)  # (TN, D)

        res_list.append(conv[(T - 1) * N:, :])         # x[:, :, -1] in torch code
        emb = conv + emb                               # fused residual connection

    # ---- attention mechanism over the L layer outputs ----------------------
    wdiag = wa_ref[...]                                # (1, D)  diag(W_a)
    v = v_ref[...]                                     # (1, D)  v[:, 0]
    ba = ba_ref[...]                                   # (1, D)  b_a
    scores = [jnp.sum(jnp.tanh(r * wdiag + ba) * v, axis=1, keepdims=True)
              for r in res_list]                       # (N, 1) each
    mx = scores[0]
    for sc in scores[1:]:
        mx = jnp.maximum(mx, sc)
    es = [jnp.exp(sc - mx) for sc in scores]
    den = es[0]
    for e_ in es[1:]:
        den = den + e_
    inv = 1.0 / den                                    # exact (accuracy concern)
    y = None
    for e_, r in zip(es, res_list):
        c = (e_ * inv) * r
        y = c if y is None else y + c
    out_ref[...] = y                                   # (N, D)


# ----------------------------------------------------------------------------
# Wrapper: one pallas_call for the whole forward pass.
# ----------------------------------------------------------------------------
def dilated_st_gcn_forward(node_emb, mte, bmat, params, alpha, kernel_size,
                           dilation_rates):
    T, N, D = node_emb.shape
    L = len(dilation_rates)
    K = kernel_size
    TN = T * N
    pad_rows = (K - 1) * max(dilation_rates) * N

    # Layout plumbing outside the kernel (tiny XLA ops).
    x2d = node_emb.reshape(TN, D).astype(jnp.float32)
    eye_t = jnp.eye(T, dtype=jnp.float32)
    blk_mask = jnp.kron(eye_t, jnp.ones((N, N), jnp.float32))            # (TN, TN)
    mteT = jnp.transpose(mte, (0, 2, 1)).astype(jnp.float32)             # (T, N, N)
    amte_bd = (float(alpha) * (mteT[:, :, None, :] *
                               eye_t[:, None, :, None])).reshape(TN, TN)  # blk-diag
    bT = jnp.asarray(bmat).T.astype(jnp.bfloat16)                        # B^T
    gcn_wT = jnp.stack([w.T for w in params["gcn_w"]]).astype(jnp.bfloat16)
    gcn_b = jnp.stack(params["gcn_b"]).astype(jnp.float32)               # (L, 1, D)
    conv_wT = jnp.stack([jnp.transpose(w, (0, 2, 1))
                         for w in params["conv_w"]]).astype(jnp.bfloat16)  # (L,K,D,D)
    conv_b = jnp.stack(params["conv_b"]).astype(jnp.float32)             # (L, 1, D)

    kernel = functools.partial(_fused_stgcn_kernel, T=T, N=N, K=K,
                               dilations=tuple(dilation_rates),
                               alpha=float(alpha), pad_rows=pad_rows)

    return pl.pallas_call(
        kernel,
        out_shape=jax.ShapeDtypeStruct((N, D), jnp.float32),
        grid_spec=pltpu.PrefetchScalarGridSpec(
            num_scalar_prefetch=0,
            grid=(1,),                                   # whole problem, one step
            in_specs=[
                pl.BlockSpec((TN, D), lambda i: (0, 0)),            # node slab
                pl.BlockSpec((TN, TN), lambda i: (0, 0)),           # block mask
                pl.BlockSpec((TN, TN), lambda i: (0, 0)),           # alpha*mte^T blkdiag
                pl.BlockSpec((D, D), lambda i: (0, 0)),             # B^T (bf16)
                pl.BlockSpec((L, D, D), lambda i: (0, 0, 0)),       # GCN W^T (bf16)
                pl.BlockSpec((L, 1, D), lambda i: (0, 0, 0)),       # GCN bias
                pl.BlockSpec((L, K, D, D), lambda i: (0, 0, 0, 0)), # conv W^T (bf16)
                pl.BlockSpec((L, 1, D), lambda i: (0, 0, 0)),       # conv bias
                pl.BlockSpec((1, D), lambda i: (0, 0)),             # diag(W_a)
                pl.BlockSpec((1, D), lambda i: (0, 0)),             # v[:, 0]
                pl.BlockSpec((1, D), lambda i: (0, 0)),             # b_a
            ],
            out_specs=pl.BlockSpec((N, D), lambda i: (0, 0)),
            scratch_shapes=[pltpu.VMEM((pad_rows + TN, D), jnp.float32)],
        ),
        compiler_params=pltpu.CompilerParams(
            dimension_semantics=("arbitrary",)),
    )(x2d, blk_mask, amte_bd, bT, gcn_wT, gcn_b, conv_wT, conv_b,
      params["wa_diag"], params["v_row"], params["ba_row"])


# ----------------------------------------------------------------------------
# Pure-JAX reference (mirrors the PyTorch semantics), for validation.
# ----------------------------------------------------------------------------
def reference_forward(node_emb, mte, bmat, params_raw, alpha, kernel_size,
                      dilation_rates):
    T, N, D = node_emb.shape
    emb = node_emb
    res_agg = []
    for li, dil in enumerate(dilation_rates):
        residual = emb
        xlast = emb[-1]
        gouts = []
        for t in range(T):
            s = jnp.maximum(emb[t] @ bmat @ xlast.T, 0.0)
            dyn = jax.nn.softmax(s, axis=0)
            adj = alpha * mte[t] + (1.0 - alpha) * dyn if li == 0 else dyn
            deg = adj.sum(axis=0)
            dinv = jnp.where(deg > 0, 1.0 / jnp.sqrt(deg), 0.0)
            adj_n = adj * dinv[:, None] * dinv[None, :]
            xw = emb[t] @ params_raw["gcn_w"][li].T
            gouts.append(jnp.maximum(adj_n.T @ xw + params_raw["gcn_b"][li], 0.0))
        gstack = jnp.stack(gouts, axis=0)
        conv = []
        for t in range(T):
            acc = jnp.broadcast_to(params_raw["conv_b"][li], (N, D))
            for k in range(kernel_size):
                st = t - (kernel_size - 1 - k) * dil
                if st >= 0:
                    acc = acc + gstack[st] @ params_raw["conv_w"][li][k].T
            conv.append(jnp.maximum(acc, 0.0))
        conv = jnp.stack(conv, axis=0)
        res_agg.append(conv[-1])
        emb = conv + residual
    x_lnd = jnp.stack(res_agg, axis=0)                          # (L, N, D)
    wdiag = jnp.diagonal(params_raw["wa"])
    s = jnp.tanh(x_lnd * wdiag[None, None, :] + params_raw["ba"][None, None, :])
    scores = jnp.sum(s * params_raw["v"][:, 0][None, None, :], axis=2)
    a = jax.nn.softmax(scores, axis=0)
    return jnp.sum(a[:, :, None] * x_lnd, axis=0)


if __name__ == "__main__":
    T, N, D = 8, 16, 16            # time steps, nodes, node_features
    kernel_size = 2
    dilation_rates = (1, 2)
    alpha = 0.6
    L = len(dilation_rates)

    key = jax.random.PRNGKey(0)
    ks = jax.random.split(key, 12)

    node_emb = 0.5 * jax.random.normal(ks[0], (T, N, D), jnp.float32)
    mte = jax.random.uniform(ks[1], (T, N, N), jnp.float32)            # static MTE matrix
    bmat = jax.random.uniform(ks[2], (D, D), jnp.float32, -0.3, 0.3)   # B.weight

    gcn_w = [jax.random.uniform(ks[3 + i], (D, D), jnp.float32, -0.3, 0.3) for i in range(L)]
    gcn_b = [jnp.zeros((1, D), jnp.float32) for _ in range(L)]         # GCNConv bias init = zeros
    conv_w = [jax.random.uniform(ks[5 + i], (kernel_size, D, D), jnp.float32, -0.3, 0.3)
              for i in range(L)]                                        # (K, out, in) == torch W[o,c,k]
    conv_b = [jax.random.uniform(ks[7 + i], (1, D), jnp.float32, -0.1, 0.1) for i in range(L)]

    wa = jax.random.uniform(ks[9], (D, D), jnp.float32, -0.4, 0.4)      # W_a
    v = jax.random.uniform(ks[10], (D, 1), jnp.float32, -0.5, 0.5)      # v
    ba = jnp.zeros((D,), jnp.float32)                                   # b_a init = zeros

    params = {
        "gcn_w": gcn_w, "gcn_b": gcn_b, "conv_w": conv_w, "conv_b": conv_b,
        "wa_diag": jnp.diagonal(wa).reshape(1, D),
        "v_row": v[:, 0].reshape(1, D),
        "ba_row": ba.reshape(1, D),
    }
    params_raw = {"gcn_w": gcn_w, "gcn_b": gcn_b, "conv_w": conv_w, "conv_b": conv_b,
                  "wa": wa, "v": v, "ba": ba}

    y = dilated_st_gcn_forward(node_emb, mte, bmat, params, alpha,
                               kernel_size, dilation_rates)
    y = jax.block_until_ready(y)

    y_ref = reference_forward(node_emb, mte, bmat, params_raw, alpha,
                              kernel_size, dilation_rates)
    max_err = float(jnp.max(jnp.abs(y - y_ref)))
    assert y.shape == (N, D), y.shape
    # bf16 MXU operands (f32 accumulation) set the scale of the tolerance.
    assert max_err < 3e-2, f"mismatch vs reference: {max_err}"

    print("KERNEL_OK")
</pallas_src>

<mosaic_0001>
module attributes {stable_mosaic.version = 11 : i64} {
  func.func @_fused_stgcn_kernel(%arg0: i32, %arg1: memref<128x16xf32, #tpu.memory_space<vmem>>, %arg2: memref<128x128xf32, #tpu.memory_space<vmem>>, %arg3: memref<128x128xf32, #tpu.memory_space<vmem>>, %arg4: memref<16x16xbf16, #tpu.memory_space<vmem>>, %arg5: memref<2x16x16xbf16, #tpu.memory_space<vmem>>, %arg6: memref<2x1x16xf32, #tpu.memory_space<vmem>>, %arg7: memref<2x2x16x16xbf16, #tpu.memory_space<vmem>>, %arg8: memref<2x1x16xf32, #tpu.memory_space<vmem>>, %arg9: memref<1x16xf32, #tpu.memory_space<vmem>>, %arg10: memref<1x16xf32, #tpu.memory_space<vmem>>, %arg11: memref<1x16xf32, #tpu.memory_space<vmem>>, %arg12: memref<16x16xf32, #tpu.memory_space<vmem>>, %arg13: memref<160x16xf32, #tpu.memory_space<vmem>>) attributes {dimension_semantics = [#tpu.dimension_semantics<arbitrary>], iteration_bounds = array<i64: 1>, scalar_prefetch = 0 : i64, scratch_operands = 1 : i64, tpu.core_type = #tpu.core_type<tc>, window_params = [{pipeline_mode = #tpu.pipeline_mode<synchronous>, transform_indices = @transform_0, window_bounds = array<i64: 128, 16>}, {pipeline_mode = #tpu.pipeline_mode<synchronous>, transform_indices = @transform_1, window_bounds = array<i64: 128, 128>}, {pipeline_mode = #tpu.pipeline_mode<synchronous>, transform_indices = @transform_2, window_bounds = array<i64: 128, 128>}, {pipeline_mode = #tpu.pipeline_mode<synchronous>, transform_indices = @transform_3, window_bounds = array<i64: 16, 16>}, {pipeline_mode = #tpu.pipeline_mode<synchronous>, transform_indices = @transform_4, window_bounds = array<i64: 2, 16, 16>}, {pipeline_mode = #tpu.pipeline_mode<synchronous>, transform_indices = @transform_5, window_bounds = array<i64: 2, 1, 16>}, {pipeline_mode = #tpu.pipeline_mode<synchronous>, transform_indices = @transform_6, window_bounds = array<i64: 2, 2, 16, 16>}, {pipeline_mode = #tpu.pipeline_mode<synchronous>, transform_indices = @transform_7, window_bounds = array<i64: 2, 1, 16>}, {pipeline_mode = #tpu.pipeline_mode<synchronous>, transform_indices = @transform_8, window_bounds = array<i64: 1, 16>}, {pipeline_mode = #tpu.pipeline_mode<synchronous>, transform_indices = @transform_9, window_bounds = array<i64: 1, 16>}, {pipeline_mode = #tpu.pipeline_mode<synchronous>, transform_indices = @transform_10, window_bounds = array<i64: 1, 16>}, {pipeline_mode = #tpu.pipeline_mode<synchronous>, transform_indices = @transform_11, window_bounds = array<i64: 16, 16>}]} {
    %cst = arith.constant 0.000000e+00 : f32
    %0 = vector.broadcast %cst : f32 to vector<32x16xf32>
    %c0 = arith.constant 0 : index
    %c0_0 = arith.constant 0 : index
    %1 = vector.load %arg13[%c0, %c0_0] : memref<160x16xf32, #tpu.memory_space<vmem>>, vector<32x16xf32>
    tpu.vector_store %arg13[%c0, %c0_0], %0 {strides = array<i32>} : memref<160x16xf32, #tpu.memory_space<vmem>>, vector<32x16xf32>,
    %c0_1 = arith.constant 0 : index
    %c0_2 = arith.constant 0 : index
    %2 = vector.load %arg2[%c0_1, %c0_2] : memref<128x128xf32, #tpu.memory_space<vmem>>, vector<128x128xf32>
    %c0_3 = arith.constant 0 : index
    %c0_4 = arith.constant 0 : index
    %3 = vector.load %arg4[%c0_3, %c0_4] : memref<16x16xbf16, #tpu.memory_space<vmem>>, vector<16x16xbf16>
    %c0_5 = arith.constant 0 : index
    %c0_6 = arith.constant 0 : index
    %4 = vector.load %arg1[%c0_5, %c0_6] : memref<128x16xf32, #tpu.memory_space<vmem>>, vector<128x16xf32>
    %5 = arith.truncf %4 : vector<128x16xf32> to vector<128x16xbf16>
    %6 = vector.extract_strided_slice %5 {offsets = [112, 0], sizes = [16, 16], strides = [1, 1]} : vector<128x16xbf16> to vector<16x16xbf16>
    %cst_7 = arith.constant dense<0.000000e+00> : vector<16x16xf32>
    %7 = tpu.matmul %6, %3, %cst_7 {dimension_numbers = #tpu.dot_dimension_numbers<[1], [0], [0], [1], [0, 0, 1, 1], [], []>} : vector<16x16xbf16>, vector<16x16xbf16>, vector<16x16xf32> -> vector<16x16xf32>
    %8 = tpu.concatenate %7, %7, %7, %7, %7, %7, %7, %7 in 0 : vector<16x16xf32>, vector<16x16xf32>, vector<16x16xf32>, vector<16x16xf32>, vector<16x16xf32>, vector<16x16xf32>, vector<16x16xf32>, vector<16x16xf32> -> vector<128x16xf32>
    %9 = arith.truncf %8 : vector<128x16xf32> to vector<128x16xbf16>
    %cst_8 = arith.constant dense<0.000000e+00> : vector<128x128xf32>
    %10 = tpu.matmul %9, %5, %cst_8 {dimension_numbers = #tpu.dot_dimension_numbers<[1], [1], [0], [0], [0, 0, 1, 0], [], []>} : vector<128x16xbf16>, vector<128x16xbf16>, vector<128x128xf32> -> vector<128x128xf32>
    %cst_9 = arith.constant 0.000000e+00 : f32
    %11 = vector.broadcast %cst_9 : f32 to vector<128x128xf32>
    %12 = arith.maximumf %10, %11 : vector<128x128xf32>
    %13 = arith.mulf %12, %2 : vector<128x128xf32>
    %cst_10 = arith.constant dense<0xFF800000> : vector<128xf32>
    %14 = vector.multi_reduction <maximumf>, %13, %cst_10 [1] : vector<128x128xf32> to vector<128xf32>
    %15 = vector.shape_cast %14 : vector<128xf32> to vector<128x1xf32>
    %16 = vector.broadcast %15 : vector<128x1xf32> to vector<128x128xf32>
    %17 = arith.subf %13, %16 : vector<128x128xf32>
    %18 = math.exp %17 : vector<128x128xf32>
    %19 = arith.mulf %18, %2 : vector<128x128xf32>
    %cst_11 = arith.constant dense<0.000000e+00> : vector<128xf32>
    %20 = vector.multi_reduction <add>, %19, %cst_11 [1] : vector<128x128xf32> to vector<128xf32>
    %21 = vector.shape_cast %20 : vector<128xf32> to vector<128x1xf32>
    %22 = vector.broadcast %21 : vector<128x1xf32> to vector<128x128xf32>
    %23 = arith.divf %19, %22 : vector<128x128xf32>
    %c0_12 = arith.constant 0 : index
    %c0_13 = arith.constant 0 : index
    %24 = vector.load %arg3[%c0_12, %c0_13] : memref<128x128xf32, #tpu.memory_space<vmem>>, vector<128x128xf32>
    %cst_14 = arith.constant 4.000000e-01 : f32
    %25 = vector.broadcast %cst_14 : f32 to vector<128x128xf32>
    %26 = arith.mulf %25, %23 : vector<128x128xf32>
    %27 = arith.addf %24, %26 : vector<128x128xf32>
    %cst_15 = arith.constant dense<0.000000e+00> : vector<128xf32>
    %28 = vector.multi_reduction <add>, %27, %cst_15 [1] : vector<128x128xf32> to vector<128xf32>
    %29 = vector.shape_cast %28 : vector<128xf32> to vector<128x1xf32>
    %cst_16 = arith.constant 0.000000e+00 : f32
    %30 = vector.broadcast %cst_16 : f32 to vector<128x1xf32>
    %31 = arith.cmpf ogt, %29, %30 : vector<128x1xf32>
    %cst_17 = arith.constant 9.99999996E-13 : f32
    %32 = vector.broadcast %cst_17 : f32 to vector<128x1xf32>
    %33 = arith.maximumf %29, %32 : vector<128x1xf32>
    %34 = math.rsqrt %33 : vector<128x1xf32>
    %cst_18 = arith.constant 0.000000e+00 : f32
    %35 = vector.broadcast %cst_18 : f32 to vector<128x1xf32>
    %36 = arith.select %31, %34, %35 : vector<128x1xi1>, vector<128x1xf32>
    %c0_19 = arith.constant 0 : index
    %c0_20 = arith.constant 0 : index
    %c0_21 = arith.constant 0 : index
    %37 = vector.load %arg5[%c0_19, %c0_20, %c0_21] : memref<2x16x16xbf16, #tpu.memory_space<vmem>>, vector<1x16x16xbf16>
    %38 = vector.shape_cast %37 : vector<1x16x16xbf16> to vector<16x16xbf16>
    %cst_22 = arith.constant dense<0.000000e+00> : vector<128x16xf32>
    %39 = tpu.matmul %5, %38, %cst_22 {dimension_numbers = #tpu.dot_dimension_numbers<[1], [0], [0], [1], [0, 0, 1, 1], [], []>} : vector<128x16xbf16>, vector<16x16xbf16>, vector<128x16xf32> -> vector<128x16xf32>
    %40 = arith.truncf %27 : vector<128x128xf32> to vector<128x128xbf16>
    %41 = vector.broadcast %36 : vector<128x1xf32> to vector<128x16xf32>
    %42 = arith.mulf %39, %41 : vector<128x16xf32>
    %43 = arith.truncf %42 : vector<128x16xf32> to vector<128x16xbf16>
    %cst_23 = arith.constant dense<0.000000e+00> : vector<128x16xf32>
    %44 = tpu.matmul %40, %43, %cst_23 {dimension_numbers = #tpu.dot_dimension_numbers<[1], [0], [0], [1], [0, 0, 1, 1], [], []>} : vector<128x128xbf16>, vector<128x16xbf16>, vector<128x16xf32> -> vector<128x16xf32>
    %45 = vector.broadcast %36 : vector<128x1xf32> to vector<128x16xf32>
    %46 = arith.mulf %44, %45 : vector<128x16xf32>
    %c0_24 = arith.constant 0 : index
    %c0_25 = arith.constant 0 : index
    %c0_26 = arith.constant 0 : index
    %47 = vector.load %arg6[%c0_24, %c0_25, %c0_26] : memref<2x1x16xf32, #tpu.memory_space<vmem>>, vector<1x1x16xf32>
    %48 = vector.shape_cast %47 : vector<1x1x16xf32> to vector<1x16xf32>
    %49 = vector.broadcast %48 : vector<1x16xf32> to vector<128x16xf32>
    %50 = arith.addf %46, %49 : vector<128x16xf32>
    %cst_27 = arith.constant 0.000000e+00 : f32
    %51 = vector.broadcast %cst_27 : f32 to vector<128x16xf32>
    %52 = arith.maximumf %50, %51 : vector<128x16xf32>
    %c32 = arith.constant 32 : index
    %c0_28 = arith.constant 0 : index
    %53 = vector.load %arg13[%c32, %c0_28] : memref<160x16xf32, #tpu.memory_space<vmem>>, vector<128x16xf32>
    tpu.vector_store %arg13[%c32, %c0_28], %52 {strides = array<i32>} : memref<160x16xf32, #tpu.memory_space<vmem>>, vector<128x16xf32>,
    %c16 = arith.constant 16 : index
    %c0_29 = arith.constant 0 : index
    %54 = vector.load %arg13[%c16, %c0_29] : memref<160x16xf32, #tpu.memory_space<vmem>>, vector<128x16xf32>
    %55 = arith.truncf %54 : vector<128x16xf32> to vector<128x16xbf16>
    %c0_30 = arith.constant 0 : index
    %c0_31 = arith.constant 0 : index
    %c0_32 = arith.constant 0 : index
    %c0_33 = arith.constant 0 : index
    %56 = vector.load %arg7[%c0_30, %c0_31, %c0_32, %c0_33] : memref<2x2x16x16xbf16, #tpu.memory_space<vmem>>, vector<1x1x16x16xbf16>
    %57 = vector.shape_cast %56 : vector<1x1x16x16xbf16> to vector<16x16xbf16>
    %cst_34 = arith.constant dense<0.000000e+00> : vector<128x16xf32>
    %58 = tpu.matmul %55, %57, %cst_34 {dimension_numbers = #tpu.dot_dimension_numbers<[1], [0], [0], [1], [0, 0, 1, 1], [], []>} : vector<128x16xbf16>, vector<16x16xbf16>, vector<128x16xf32> -> vector<128x16xf32>
    %c32_35 = arith.constant 32 : index
    %c0_36 = arith.constant 0 : index
    %59 = vector.load %arg13[%c32_35, %c0_36] : memref<160x16xf32, #tpu.memory_space<vmem>>, vector<128x16xf32>
    %60 = arith.truncf %59 : vector<128x16xf32> to vector<128x16xbf16>
    %c0_37 = arith.constant 0 : index
    %c1 = arith.constant 1 : index
    %c0_38 = arith.constant 0 : index
    %c0_39 = arith.constant 0 : index
    %61 = vector.load %arg7[%c0_37, %c1, %c0_38, %c0_39] : memref<2x2x16x16xbf16, #tpu.memory_space<vmem>>, vector<1x1x16x16xbf16>
    %62 = vector.shape_cast %61 : vector<1x1x16x16xbf16> to vector<16x16xbf16>
    %cst_40 = arith.constant dense<0.000000e+00> : vector<128x16xf32>
    %63 = tpu.matmul %60, %62, %cst_40 {dimension_numbers = #tpu.dot_dimension_numbers<[1], [0], [0], [1], [0, 0, 1, 1], [], []>} : vector<128x16xbf16>, vector<16x16xbf16>, vector<128x16xf32> -> vector<128x16xf32>
    %64 = arith.addf %58, %63 : vector<128x16xf32>
    %c0_41 = arith.constant 0 : index
    %c0_42 = arith.constant 0 : index
    %c0_43 = arith.constant 0 : index
    %65 = vector.load %arg8[%c0_41, %c0_42, %c0_43] : memref<2x1x16xf32, #tpu.memory_space<vmem>>, vector<1x1x16xf32>
    %66 = vector.shape_cast %65 : vector<1x1x16xf32> to vector<1x16xf32>
    %67 = vector.broadcast %66 : vector<1x16xf32> to vector<128x16xf32>
    %68 = arith.addf %64, %67 : vector<128x16xf32>
    %cst_44 = arith.constant 0.000000e+00 : f32
    %69 = vector.broadcast %cst_44 : f32 to vector<128x16xf32>
    %70 = arith.maximumf %68, %69 : vector<128x16xf32>
    %71 = vector.extract_strided_slice %70 {offsets = [112, 0], sizes = [16, 16], strides = [1, 1]} : vector<128x16xf32> to vector<16x16xf32>
    %72 = arith.addf %70, %4 : vector<128x16xf32>
    %73 = arith.truncf %72 : vector<128x16xf32> to vector<128x16xbf16>
    %74 = vector.extract_strided_slice %73 {offsets = [112, 0], sizes = [16, 16], strides = [1, 1]} : vector<128x16xbf16> to vector<16x16xbf16>
    %cst_45 = arith.constant dense<0.000000e+00> : vector<16x16xf32>
    %75 = tpu.matmul %74, %3, %cst_45 {dimension_numbers = #tpu.dot_dimension_numbers<[1], [0], [0], [1], [0, 0, 1, 1], [], []>} : vector<16x16xbf16>, vector<16x16xbf16>, vector<16x16xf32> -> vector<16x16xf32>
    %76 = tpu.concatenate %75, %75, %75, %75, %75, %75, %75, %75 in 0 : vector<16x16xf32>, vector<16x16xf32>, vector<16x16xf32>, vector<16x16xf32>, vector<16x16xf32>, vector<16x16xf32>, vector<16x16xf32>, vector<16x16xf32> -> vector<128x16xf32>
    %77 = arith.truncf %76 : vector<128x16xf32> to vector<128x16xbf16>
    %cst_46 = arith.constant dense<0.000000e+00> : vector<128x128xf32>
    %78 = tpu.matmul %77, %73, %cst_46 {dimension_numbers = #tpu.dot_dimension_numbers<[1], [1], [0], [0], [0, 0, 1, 0], [], []>} : vector<128x16xbf16>, vector<128x16xbf16>, vector<128x128xf32> -> vector<128x128xf32>
    %cst_47 = arith.constant 0.000000e+00 : f32
    %79 = vector.broadcast %cst_47 : f32 to vector<128x128xf32>
    %80 = arith.maximumf %78, %79 : vector<128x128xf32>
    %81 = arith.mulf %80, %2 : vector<128x128xf32>
    %cst_48 = arith.constant dense<0xFF800000> : vector<128xf32>
    %82 = vector.multi_reduction <maximumf>, %81, %cst_48 [1] : vector<128x128xf32> to vector<128xf32>
    %83 = vector.shape_cast %82 : vector<128xf32> to vector<128x1xf32>
    %84 = vector.broadcast %83 : vector<128x1xf32> to vector<128x128xf32>
    %85 = arith.subf %81, %84 : vector<128x128xf32>
    %86 = math.exp %85 : vector<128x128xf32>
    %87 = arith.mulf %86, %2 : vector<128x128xf32>
    %cst_49 = arith.constant dense<0.000000e+00> : vector<128xf32>
    %88 = vector.multi_reduction <add>, %87, %cst_49 [1] : vector<128x128xf32> to vector<128xf32>
    %89 = vector.shape_cast %88 : vector<128xf32> to vector<128x1xf32>
    %90 = vector.broadcast %89 : vector<128x1xf32> to vector<128x128xf32>
    %91 = arith.divf %87, %90 : vector<128x128xf32>
    %cst_50 = arith.constant dense<0.000000e+00> : vector<128xf32>
    %92 = vector.multi_reduction <add>, %91, %cst_50 [1] : vector<128x128xf32> to vector<128xf32>
    %93 = vector.shape_cast %92 : vector<128xf32> to vector<128x1xf32>
    %cst_51 = arith.constant 0.000000e+00 : f32
    %94 = vector.broadcast %cst_51 : f32 to vector<128x1xf32>
    %95 = arith.cmpf ogt, %93, %94 : vector<128x1xf32>
    %cst_52 = arith.constant 9.99999996E-13 : f32
    %96 = vector.broadcast %cst_52 : f32 to vector<128x1xf32>
    %97 = arith.maximumf %93, %96 : vector<128x1xf32>
    %98 = math.rsqrt %97 : vector<128x1xf32>
    %cst_53 = arith.constant 0.000000e+00 : f32
    %99 = vector.broadcast %cst_53 : f32 to vector<128x1xf32>
    %100 = arith.select %95, %98, %99 : vector<128x1xi1>, vector<128x1xf32>
    %c1_54 = arith.constant 1 : index
    %c0_55 = arith.constant 0 : index
    %c0_56 = arith.constant 0 : index
    %101 = vector.load %arg5[%c1_54, %c0_55, %c0_56] : memref<2x16x16xbf16, #tpu.memory_space<vmem>>, vector<1x16x16xbf16>
    %102 = vector.shape_cast %101 : vector<1x16x16xbf16> to vector<16x16xbf16>
    %cst_57 = arith.constant dense<0.000000e+00> : vector<128x16xf32>
    %103 = tpu.matmul %73, %102, %cst_57 {dimension_numbers = #tpu.dot_dimension_numbers<[1], [0], [0], [1], [0, 0, 1, 1], [], []>} : vector<128x16xbf16>, vector<16x16xbf16>, vector<128x16xf32> -> vector<128x16xf32>
    %104 = arith.truncf %91 : vector<128x128xf32> to vector<128x128xbf16>
    %105 = vector.broadcast %100 : vector<128x1xf32> to vector<128x16xf32>
    %106 = arith.mulf %103, %105 : vector<128x16xf32>
    %107 = arith.truncf %106 : vector<128x16xf32> to vector<128x16xbf16>
    %cst_58 = arith.constant dense<0.000000e+00> : vector<128x16xf32>
    %108 = tpu.matmul %104, %107, %cst_58 {dimension_numbers = #tpu.dot_dimension_numbers<[1], [0], [0], [1], [0, 0, 1, 1], [], []>} : vector<128x128xbf16>, vector<128x16xbf16>, vector<128x16xf32> -> vector<128x16xf32>
    %109 = vector.broadcast %100 : vector<128x1xf32> to vector<128x16xf32>
    %110 = arith.mulf %108, %109 : vector<128x16xf32>
    %c1_59 = arith.constant 1 : index
    %c0_60 = arith.constant 0 : index
    %c0_61 = arith.constant 0 : index
    %111 = vector.load %arg6[%c1_59, %c0_60, %c0_61] : memref<2x1x16xf32, #tpu.memory_space<vmem>>, vector<1x1x16xf32>
    %112 = vector.shape_cast %111 : vector<1x1x16xf32> to vector<1x16xf32>
    %113 = vector.broadcast %112 : vector<1x16xf32> to vector<128x16xf32>
    %114 = arith.addf %110, %113 : vector<128x16xf32>
    %cst_62 = arith.constant 0.000000e+00 : f32
    %115 = vector.broadcast %cst_62 : f32 to vector<128x16xf32>
    %116 = arith.maximumf %114, %115 : vector<128x16xf32>
    %c32_63 = arith.constant 32 : index
    %c0_64 = arith.constant 0 : index
    %117 = vector.load %arg13[%c32_63, %c0_64] : memref<160x16xf32, #tpu.memory_space<vmem>>, vector<128x16xf32>
    tpu.vector_store %arg13[%c32_63, %c0_64], %116 {strides = array<i32>} : memref<160x16xf32, #tpu.memory_space<vmem>>, vector<128x16xf32>,
    %c0_65 = arith.constant 0 : index
    %c0_66 = arith.constant 0 : index
    %118 = vector.load %arg13[%c0_65, %c0_66] : memref<160x16xf32, #tpu.memory_space<vmem>>, vector<128x16xf32>
    %119 = arith.truncf %118 : vector<128x16xf32> to vector<128x16xbf16>
    %c1_67 = arith.constant 1 : index
    %c0_68 = arith.constant 0 : index
    %c0_69 = arith.constant 0 : index
    %c0_70 = arith.constant 0 : index
    %120 = vector.load %arg7[%c1_67, %c0_68, %c0_69, %c0_70] : memref<2x2x16x16xbf16, #tpu.memory_space<vmem>>, vector<1x1x16x16xbf16>
    %121 = vector.shape_cast %120 : vector<1x1x16x16xbf16> to vector<16x16xbf16>
    %cst_71 = arith.constant dense<0.000000e+00> : vector<128x16xf32>
    %122 = tpu.matmul %119, %121, %cst_71 {dimension_numbers = #tpu.dot_dimension_numbers<[1], [0], [0], [1], [0, 0, 1, 1], [], []>} : vector<128x16xbf16>, vector<16x16xbf16>, vector<128x16xf32> -> vector<128x16xf32>
    %c32_72 = arith.constant 32 : index
    %c0_73 = arith.constant 0 : index
    %123 = vector.load %arg13[%c32_72, %c0_73] : memref<160x16xf32, #tpu.memory_space<vmem>>, vector<128x16xf32>
    %124 = arith.truncf %123 : vector<128x16xf32> to vector<128x16xbf16>
    %c1_74 = arith.constant 1 : index
    %c1_75 = arith.constant 1 : index
    %c0_76 = arith.constant 0 : index
    %c0_77 = arith.constant 0 : index
    %125 = vector.load %arg7[%c1_74, %c1_75, %c0_76, %c0_77] : memref<2x2x16x16xbf16, #tpu.memory_space<vmem>>, vector<1x1x16x16xbf16>
    %126 = vector.shape_cast %125 : vector<1x1x16x16xbf16> to vector<16x16xbf16>
    %cst_78 = arith.constant dense<0.000000e+00> : vector<128x16xf32>
    %127 = tpu.matmul %124, %126, %cst_78 {dimension_numbers = #tpu.dot_dimension_numbers<[1], [0], [0], [1], [0, 0, 1, 1], [], []>} : vector<128x16xbf16>, vector<16x16xbf16>, vector<128x16xf32> -> vector<128x16xf32>
    %128 = arith.addf %122, %127 : vector<128x16xf32>
    %c1_79 = arith.constant 1 : index
    %c0_80 = arith.constant 0 : index
    %c0_81 = arith.constant 0 : index
    %129 = vector.load %arg8[%c1_79, %c0_80, %c0_81] : memref<2x1x16xf32, #tpu.memory_space<vmem>>, vector<1x1x16xf32>
    %130 = vector.shape_cast %129 : vector<1x1x16xf32> to vector<1x16xf32>
    %131 = vector.broadcast %130 : vector<1x16xf32> to vector<128x16xf32>
    %132 = arith.addf %128, %131 : vector<128x16xf32>
    %cst_82 = arith.constant 0.000000e+00 : f32
    %133 = vector.broadcast %cst_82 : f32 to vector<128x16xf32>
    %134 = arith.maximumf %132, %133 : vector<128x16xf32>
    %135 = vector.extract_strided_slice %134 {offsets = [112, 0], sizes = [16, 16], strides = [1, 1]} : vector<128x16xf32> to vector<16x16xf32>
    %c0_83 = arith.constant 0 : index
    %c0_84 = arith.constant 0 : index
    %136 = vector.load %arg9[%c0_83, %c0_84] : memref<1x16xf32, #tpu.memory_space<vmem>>, vector<1x16xf32>
    %c0_85 = arith.constant 0 : index
    %c0_86 = arith.constant 0 : index
    %137 = vector.load %arg10[%c0_85, %c0_86] : memref<1x16xf32, #tpu.memory_space<vmem>>, vector<1x16xf32>
    %c0_87 = arith.constant 0 : index
    %c0_88 = arith.constant 0 : index
    %138 = vector.load %arg11[%c0_87, %c0_88] : memref<1x16xf32, #tpu.memory_space<vmem>>, vector<1x16xf32>
    %139 = vector.broadcast %136 : vector<1x16xf32> to vector<16x16xf32>
    %140 = arith.mulf %71, %139 : vector<16x16xf32>
    %141 = vector.broadcast %138 : vector<1x16xf32> to vector<16x16xf32>
    %142 = arith.addf %140, %141 : vector<16x16xf32>
    %143 = math.tanh %142 : vector<16x16xf32>
    %144 = vector.broadcast %137 : vector<1x16xf32> to vector<16x16xf32>
    %145 = arith.mulf %143, %144 : vector<16x16xf32>
    %cst_89 = arith.constant dense<0.000000e+00> : vector<16xf32>
    %146 = vector.multi_reduction <add>, %145, %cst_89 [1] : vector<16x16xf32> to vector<16xf32>
    %147 = vector.shape_cast %146 : vector<16xf32> to vector<16x1xf32>
    %148 = vector.broadcast %136 : vector<1x16xf32> to vector<16x16xf32>
    %149 = arith.mulf %135, %148 : vector<16x16xf32>
    %150 = vector.broadcast %138 : vector<1x16xf32> to vector<16x16xf32>
    %151 = arith.addf %149, %150 : vector<16x16xf32>
    %152 = math.tanh %151 : vector<16x16xf32>
    %153 = vector.broadcast %137 : vector<1x16xf32> to vector<16x16xf32>
    %154 = arith.mulf %152, %153 : vector<16x16xf32>
    %cst_90 = arith.constant dense<0.000000e+00> : vector<16xf32>
    %155 = vector.multi_reduction <add>, %154, %cst_90 [1] : vector<16x16xf32> to vector<16xf32>
    %156 = vector.shape_cast %155 : vector<16xf32> to vector<16x1xf32>
    %157 = arith.maximumf %147, %156 : vector<16x1xf32>
    %158 = arith.subf %147, %157 : vector<16x1xf32>
    %159 = math.exp %158 : vector<16x1xf32>
    %160 = arith.subf %156, %157 : vector<16x1xf32>
    %161 = math.exp %160 : vector<16x1xf32>
    %162 = arith.addf %159, %161 : vector<16x1xf32>
    %cst_91 = arith.constant 1.000000e+00 : f32
    %163 = vector.broadcast %cst_91 : f32 to vector<16x1xf32>
    %164 = arith.divf %163, %162 : vector<16x1xf32>
    %165 = arith.mulf %159, %164 : vector<16x1xf32>
    %166 = vector.broadcast %165 : vector<16x1xf32> to vector<16x16xf32>
    %167 = arith.mulf %166, %71 : vector<16x16xf32>
    %168 = arith.mulf %161, %164 : vector<16x1xf32>
    %169 = vector.broadcast %168 : vector<16x1xf32> to vector<16x16xf32>
    %170 = arith.mulf %169, %135 : vector<16x16xf32>
    %171 = arith.addf %167, %170 : vector<16x16xf32>
    %c0_92 = arith.constant 0 : index
    %c0_93 = arith.constant 0 : index
    %172 = vector.load %arg12[%c0_92, %c0_93] : memref<16x16xf32, #tpu.memory_space<vmem>>, vector<16x16xf32>
    tpu.vector_store %arg12[%c0_92, %c0_93], %171 {strides = array<i32>} : memref<16x16xf32, #tpu.memory_space<vmem>>, vector<16x16xf32>,
    return
  }
  func.func @transform_0(%arg0: i32) -> (i32, i32) {
    %c0_i32 = arith.constant 0 : i32
    %c0_i32_0 = arith.constant 0 : i32
    %c0_i32_1 = arith.constant 0 : i32
    return %c0_i32, %c0_i32_0 : i32, i32
  }
  func.func @transform_1(%arg0: i32) -> (i32, i32) {
    %c0_i32 = arith.constant 0 : i32
    %c0_i32_0 = arith.constant 0 : i32
    %c0_i32_1 = arith.constant 0 : i32
    return %c0_i32, %c0_i32_0 : i32, i32
  }
  func.func @transform_2(%arg0: i32) -> (i32, i32) {
    %c0_i32 = arith.constant 0 : i32
    %c0_i32_0 = arith.constant 0 : i32
    %c0_i32_1 = arith.constant 0 : i32
    return %c0_i32, %c0_i32_0 : i32, i32
  }
  func.func @transform_3(%arg0: i32) -> (i32, i32) {
    %c0_i32 = arith.constant 0 : i32
    %c0_i32_0 = arith.constant 0 : i32
    %c0_i32_1 = arith.constant 0 : i32
    return %c0_i32, %c0_i32_0 : i32, i32
  }
  func.func @transform_4(%arg0: i32) -> (i32, i32, i32) {
    %c0_i32 = arith.constant 0 : i32
    %c0_i32_0 = arith.constant 0 : i32
    %c0_i32_1 = arith.constant 0 : i32
    %c0_i32_2 = arith.constant 0 : i32
    return %c0_i32, %c0_i32_0, %c0_i32_1 : i32, i32, i32
  }
  func.func @transform_5(%arg0: i32) -> (i32, i32, i32) {
    %c0_i32 = arith.constant 0 : i32
    %c0_i32_0 = arith.constant 0 : i32
    %c0_i32_1 = arith.constant 0 : i32
    %c0_i32_2 = arith.constant 0 : i32
    return %c0_i32, %c0_i32_0, %c0_i32_1 : i32, i32, i32
  }
  func.func @transform_6(%arg0: i32) -> (i32, i32, i32, i32) {
    %c0_i32 = arith.constant 0 : i32
    %c0_i32_0 = arith.constant 0 : i32
    %c0_i32_1 = arith.constant 0 : i32
    %c0_i32_2 = arith.constant 0 : i32
    %c0_i32_3 = arith.constant 0 : i32
    return %c0_i32, %c0_i32_0, %c0_i32_1, %c0_i32_2 : i32, i32, i32, i32
  }
  func.func @transform_7(%arg0: i32) -> (i32, i32, i32) {
    %c0_i32 = arith.constant 0 : i32
    %c0_i32_0 = arith.constant 0 : i32
    %c0_i32_1 = arith.constant 0 : i32
    %c0_i32_2 = arith.constant 0 : i32
    return %c0_i32, %c0_i32_0, %c0_i32_1 : i32, i32, i32
  }
  func.func @transform_8(%arg0: i32) -> (i32, i32) {
    %c0_i32 = arith.constant 0 : i32
    %c0_i32_0 = arith.constant 0 : i32
    %c0_i32_1 = arith.constant 0 : i32
    return %c0_i32, %c0_i32_0 : i32, i32
  }
  func.func @transform_9(%arg0: i32) -> (i32, i32) {
    %c0_i32 = arith.constant 0 : i32
    %c0_i32_0 = arith.constant 0 : i32
    %c0_i32_1 = arith.constant 0 : i32
    return %c0_i32, %c0_i32_0 : i32, i32
  }
  func.func @transform_10(%arg0: i32) -> (i32, i32) {
    %c0_i32 = arith.constant 0 : i32
    %c0_i32_0 = arith.constant 0 : i32
    %c0_i32_1 = arith.constant 0 : i32
    return %c0_i32, %c0_i32_0 : i32, i32
  }
  func.func @transform_11(%arg0: i32) -> (i32, i32) {
    %c0_i32 = arith.constant 0 : i32
    %c0_i32_0 = arith.constant 0 : i32
    %c0_i32_1 = arith.constant 0 : i32
    return %c0_i32, %c0_i32_0 : i32, i32
  }
}

</mosaic_0001>

<bundles_post_ra>
// kernel: tpu_custom_call.1
= control target key start
LH: loop header
LB: loop body
LE: loop exit
PB: predicated region body
PF: predicated region fallthrough
CT: control target
= control target key end

     0   :  { %16 = vsyncpa [#allocation4], 0  ;;  %s4563_s0 = inlined_call_operand.vmem [shape: f32[128,16], index: 0, kind: input, shape index: {}]   ;;  %s4564_s1 = inlined_call_operand.vmem [shape: f32[128,128], index: 1, kind: input, shape index: {}]   ;;  %s4565_s2 = inlined_call_operand.hbm [shape: f32[128,128], index: 2, kind: input, shape index: {}]   ;;  %s4566_s3 = inlined_call_operand.hbm [shape: bf16[16,16], index: 3, kind: input, shape index: {}]   ;;  %s4567_s4 = inlined_call_operand.vmem [shape: bf16[2,16,16], index: 4, kind: input, shape index: {}]   ;;  %s4568_s5 = inlined_call_operand.vmem [shape: f32[2,1,16], index: 5, kind: input, shape index: {}]   ;;  %s4569_s6 = inlined_call_operand.hbm [shape: bf16[2,2,16,16], index: 6, kind: input, shape index: {}]   ;;  %s4570_s7 = inlined_call_operand.vmem [shape: f32[2,1,16], index: 7, kind: input, shape index: {}]   ;;  %s4571_s8 = inlined_call_operand.vmem [shape: f32[1,16], index: 8, kind: input, shape index: {}]   ;;  %s4572_s9 = inlined_call_operand.vmem [shape: f32[1,16], index: 9, kind: input, shape index: {}]   ;;  %s4573_s10 = inlined_call_operand.vmem [shape: f32[1,16], index: 10, kind: input, shape index: {}]   ;;  %s4574_s11 = inlined_call_operand.hbm [shape: f32[16,16], index: 11, kind: output, shape index: {}]  }
   0x1   :  { %17 = vsyncpa [#allocation7], 0 }
   0x2   :  { %18 = vsyncpa [#allocation5], 0  ;;  %s3203_s17 = smov [#allocation6]  }
   0x3   :  { %s40_s18 = sshll.u32 %s3203_s17, 4  ;;  %s41_s18 = int_to_ptr.vmem [resolvable:$true] %s40_s18 }
   0x4   :  { %s3125_s19 = scalar_lea.vmem %s41_s18, 128  ;;  %p3130_p1 = scmp.lt.s32.totalorder %s41_s18, %s41_s18 }
   0x5   :  { %p3126_p0 = scmp.ne.s32.totalorder %s41_s18, %s3125_s19  ;;  %p3131_p2 = scmp.lt.s32.totalorder %s3125_s19, %s3125_s19 }
   0x7   :  { %p3132_p3 = por %p3131_p2, %p3130_p1 }
   0x9   :  { %p3133_p4 = pnand %p3132_p3, %p3126_p0 }
   0xb   :  { %3136 = shalt.err (!%p3133_p4)
}
   0xc   :  { %s3204_s20 = smov 64   ;;  %s3205_s21 = smov 4  }
   0xd   :  { %46 = dma.hbm_to_vmem [thread:$0]  %s4566_s3, 128, %s41_s18, [#allocation7], %s3204_s20, %s3204_s20, %s3205_s21  }
   0xe   :  { %s3206_s24 = smov [#allocation3]  }
   0xf   :  { %s28_s25 = sshll.u32 %s3206_s24, 4  ;;  %s29_s25 = int_to_ptr.vmem [resolvable:$true] %s28_s25 }
  0x10   :  { %s3145_s26 = scalar_lea.vmem %s29_s25, 2048  ;;  %p3150_p6 = scmp.lt.s32.totalorder %s29_s25, %s29_s25 }
  0x11   :  { %p3146_p5 = scmp.ne.s32.totalorder %s29_s25, %s3145_s26  ;;  %p3151_p7 = scmp.lt.s32.totalorder %s3145_s26, %s3145_s26 }
  0x13   :  { %p3152_p8 = por %p3151_p7, %p3150_p6 }
  0x15   :  { %p3153_p9 = pnand %p3152_p8, %p3146_p5 }
  0x17   :  { %3156 = shalt.err (!%p3153_p9)
}
  0x18   :  { %s3207_s27 = smov 128   ;;  %s3208_s28 = smov 8  }
  0x19   :  { %34 = dma.hbm_to_vmem [thread:$0]  %s4565_s2, 2048, %s29_s25, [#allocation4], %s3207_s27, %s3207_s27, %s3208_s28  }
  0x1a   :  { %s3209_s3 = smov [#allocation8]  }
  0x1b   :  { %s56_s12 = sshll.u32 %s3209_s3, 4  ;;  %s57_s12 = int_to_ptr.vmem [resolvable:$true] %s56_s12 }
  0x1c   :  { %s3165_s13 = scalar_lea.vmem %s57_s12, 512  ;;  %p3170_p11 = scmp.lt.s32.totalorder %s57_s12, %s57_s12 }
  0x1d   :  { %p3166_p10 = scmp.ne.s32.totalorder %s57_s12, %s3165_s13  ;;  %p3171_p12 = scmp.lt.s32.totalorder %s3165_s13, %s3165_s13 }
  0x1f   :  { %p3172_p13 = por %p3171_p12, %p3170_p11 }
  0x21   :  { %p3173_p0 = pnand %p3172_p13, %p3166_p10 }
  0x23   :  { %3176 = shalt.err (!%p3173_p0)
}
  0x24   :  { %62 = dma.hbm_to_vmem [thread:$0]  %s4569_s6, 512, %s57_s12, [#allocation7], %s3204_s20, %s3204_s20, %s3205_s21  }
  0x25   :  { %3197 = dma.done.wait [#allocation4], 2048  }
  0x26   :  { %3198 = vsyncadd [#allocation4], 4294965248 }
  0x27   :  { %3199 = dma.done.wait [#allocation7], 640  }
  0x28   :  { %3200 = vsyncadd [#allocation7], 4294966656  ;;  %vm81_vm0 = vcmask 130048   ;;  %v3210_v0 = vmov 0.0   ;;  %vm3211_vm1 = vmmov 0   ;;  %v2865_v1 = vld [vmem:[#allocation6] sm:$0xff]  }
  0x29   :  { %82 = vst.msk [vmem:[#allocation2] sm:$0xff] %vm81_vm0, %v3210_v0  ;;  %83 = vst.msk [vmem:[#allocation2 + $0x8] sm:$0xff] %vm81_vm0, %v3210_v0  ;;  %2591 = vmatprep.subr.bf16.mxu0 %v3210_v0  ;;  %2593 = vmatprep.mubr.msk.bf16.mxu0 %vm3211_vm1, %v3210_v0  ;;  %v118_v2 = vld [vmem:[%s4563_s0 + $0x70] sm:$0xff]  ;;  %v119_v3 = vld [vmem:[%s4563_s0 + $0x78] sm:$0xff] }
  0x2a   :  { %84 = vst.msk [vmem:[#allocation2 + $0x10] sm:$0xff] %vm81_vm0, %v3210_v0  ;;  %85 = vst.msk [vmem:[#allocation2 + $0x18] sm:$0xff] %vm81_vm0, %v3210_v0  ;;  %v116_v4 = vld [vmem:[%s4563_s0 + $0x60] sm:$0xff]  ;;  %2592 = vmatpush3.bf16.msra.mxu0 %v2865_v1  ;;  %v3305_v5 = vpack.c.bf16 %v119_v3, %v118_v2  ;;  %v117_v6 = vld [vmem:[%s4563_s0 + $0x68] sm:$0xff] }
  0x2b   :  { %v3310_v7 = vpack.c.bf16 %v117_v6, %v116_v4  ;;  %v114_v9 = vld [vmem:[%s4563_s0 + $0x50] sm:$0xff]  ;;  %v115_v10 = vld [vmem:[%s4563_s0 + $0x58] sm:$0xff]  ;;  %v112_v13 = vld [vmem:[%s4563_s0 + $0x40] sm:$0xff] }
  0x2c   :  { %2839 = vmatprep.subr.msk.bf16.mxu1 %vm81_vm0, %v3305_v5  ;;  %v135_v8 = vsel %vm81_vm0, %v3305_v5, 0  ;;  %v3328_v12 = vpack.c.bf16 %v115_v10, %v114_v9  ;;  %v113_v14 = vld [vmem:[%s4563_s0 + $0x48] sm:$0xff]  ;;  %v110_v17 = vld [vmem:[%s4563_s0 + $0x30] sm:$0xff]  ;;  %v111_v18 = vld [vmem:[%s4563_s0 + $0x38] sm:$0xff] }
  0x2d   :  { %2594 = vmatmul.mubr.msk.bf16.vlgmr.msra.gmra.mxu0 %vm81_vm0, %v3305_v5  ;;  %2598 = vmatpush3.bf16.xpose.msra.mxu1 %v135_v8  ;;  %v201_v11 = vsel %vm81_vm0, %v3310_v7, 0  ;;  %v3340_v16 = vpack.c.bf16 %v113_v14, %v112_v13  ;;  %v3352_v20 = vpack.c.bf16 %v111_v18, %v110_v17  ;;  %v108_v21 = vld [vmem:[%s4563_s0 + $0x20] sm:$0xff]  ;;  %v109_v22 = vld [vmem:[%s4563_s0 + $0x28] sm:$0xff]  ;;  %v106_v25 = vld [vmem:[%s4563_s0 + $0x10] sm:$0xff] }
  0x2e   :  { %2840 = vmatprep.subr.msk.bf16.mxu1 %vm81_vm0, %v3310_v7  ;;  %v198_v15 = vsel %vm81_vm0, %v3328_v12, 0  ;;  %v3364_v24 = vpack.c.bf16 %v109_v22, %v108_v21  ;;  %v107_v26 = vld [vmem:[%s4563_s0 + $0x18] sm:$0xff]  ;;  %v104_v30 = vld [vmem:[%s4563_s0] sm:$0xff]  ;;  %v105_v31 = vld [vmem:[%s4563_s0 + $0x8] sm:$0xff] }
  0x2f   :  { %v195_v19 = vsel %vm81_vm0, %v3340_v16, 0  ;;  %v192_v23 = vsel %vm81_vm0, %v3352_v20, 0  ;;  %v3376_v28 = vpack.c.bf16 %v107_v26, %v106_v25  ;;  %v120_v32 = vpack.c.bf16 %v105_v31, %v104_v30  ;;  %v3410_v52 = vld [vmem:[%s4564_s1 + $0x70] sm:$0xff]  ;;  %v3415_v55 = vld [vmem:[%s4564_s1 + $0x60] sm:$0xff]  ;;  %v3423_v59 = vld [vmem:[%s4564_s1 + $0x78] sm:$0xff] }
  0x30   :  { %v189_v27 = vsel %vm81_vm0, %v3364_v24, 0  ;;  %v3432_v63 = vld [vmem:[%s4564_s1 + $0x68] sm:$0xff]  ;;  %v3441_v4 = vld [vmem:[%s4564_s1 + $0x50] sm:$0xff]  ;;  %v3450_v9 = vld [vmem:[%s4564_s1 + $0x58] sm:$0xff] }
  0x31   :  { %v186_v29 = vsel %vm81_vm0, %v3376_v28, 0  ;;  %v183_v33 = vsel %vm81_vm0, %v120_v32, 0  ;;  %2631 = vmatprep.mubr.msk.bf16.mxu0 %vm81_vm0, %v120_v32  ;;  %v3459_v13 = vld [vmem:[%s4564_s1 + $0x40] sm:$0xff]  ;;  %v3468_v17 = vld [vmem:[%s4564_s1 + $0x48] sm:$0xff]  ;;  %v3477_v21 = vld [vmem:[%s4564_s1 + $0x30] sm:$0xff] }
  0x32   :  { %v3486_v25 = vld [vmem:[%s4564_s1 + $0x38] sm:$0xff] }
  0x35   :  { %2600 = vmatpush3.bf16.xpose.msra.mxu1 %v201_v11 }
  0x36   :  { %2841 = vmatprep.subr.msk.bf16.mxu1 %vm81_vm0, %v3328_v12 }
  0x3d   :  { %2602 = vmatpush3.bf16.xpose.msra.mxu1 %v198_v15 }
  0x3e   :  { %2842 = vmatprep.subr.msk.bf16.mxu1 %vm81_vm0, %v3340_v16 }
  0x45   :  { %2604 = vmatpush3.bf16.xpose.msra.mxu1 %v195_v19 }
  0x46   :  { %2843 = vmatprep.subr.msk.bf16.mxu1 %vm81_vm0, %v3352_v20 }
  0x4d   :  { %2606 = vmatpush3.bf16.xpose.msra.mxu1 %v192_v23 }
  0x4e   :  { %2844 = vmatprep.subr.msk.bf16.mxu1 %vm81_vm0, %v3364_v24 }
  0x55   :  { %2608 = vmatpush3.bf16.xpose.msra.mxu1 %v189_v27 }
  0x56   :  { %2845 = vmatprep.subr.msk.bf16.mxu1 %vm81_vm0, %v3376_v28 }
  0x5d   :  { %2610 = vmatpush3.bf16.xpose.msra.mxu1 %v186_v29  ;;  %v3495_v29 = vld [vmem:[%s4564_s1 + $0x20] sm:$0xff] }
  0x5e   :  { %2846 = vmatprep.subr.msk.bf16.mxu1 %vm81_vm0, %v120_v32  ;;  %v3504_v32 = vld [vmem:[%s4564_s1 + $0x28] sm:$0xff] }
  0x65   :  { %2612 = vmatpush3.bf16.xpose.msra.mxu1 %v183_v33 }
  0xed   :  { %v171_v34 = vpop.f32.mrf.mxu0 }
  0xef   :  { %v2595_v35 = vpop.f32.mrf.mxu0 }
  0xf0   :  { %v3514_v35 = vld [vmem:[%s4564_s1 + $0x10] sm:$0xff] }
  0xf1   :  { %v174_v36 = vpop.f32.mrf.mxu0 }
  0xf2   :  { %v178_v37 = vpack.c.bf16 %v174_v36, %v171_v34 }
  0xf3   :  { %v2596_v38 = vpop.f32.mrf.mxu0 }
  0xf4   :  { %2613 = vmatprep.mubr.msk.bf16.mxu1 %vm81_vm0, %v178_v37  ;;  %v3524_v38 = vld [vmem:[%s4564_s1 + $0x18] sm:$0xff] }
  0xf5   :  { %2614 = vmatmul.mubr.msk.bf16.vlgmr.msra.gmra.mxu1 %vm81_vm0, %v178_v37 }
  0xf6   :  { %2617 = vmatprep.mubr.msk.bf16.mxu1 %vm81_vm0, %v178_v37 }
  0xfd   :  { %2618 = vmatmul.mubr.msk.bf16.gmra.mxu1 %vm81_vm0, %v178_v37 }
  0xfe   :  { %2621 = vmatprep.mubr.msk.bf16.mxu1 %vm81_vm0, %v178_v37 }
 0x105   :  { %2622 = vmatmul.mubr.msk.bf16.gmra.mxu1 %vm81_vm0, %v178_v37 }
 0x106   :  { %2625 = vmatprep.mubr.msk.bf16.mxu1 %vm81_vm0, %v178_v37 }
 0x10d   :  { %2626 = vmatmul.mubr.msk.bf16.gmra.mxu1 %vm81_vm0, %v178_v37 }
 0x1b5   :  { %v3399_v39 = vpop.f32.mrf.mxu1 }
 0x1b6   :  { %v302_v33 = vmax.f32 %v3399_v39, 0.0 }
 0x1b7   :  { %v3401_v40 = vpop.f32.mrf.mxu1 }
 0x1b8   :  { %v300_v39 = vmax.f32 %v3401_v40, 0.0  ;;  %v3544_v40 = vld [vmem:[%s4564_s1 + $0x8] sm:$0xff] }
 0x1b9   :  { %v3403_v41 = vpop.f32.mrf.mxu1 }
 0x1ba   :  { %v303_v36 = vmax.f32 %v3403_v41, 0.0  ;;  %v3534_v41 = vld [vmem:[%s4564_s1] sm:$0xff] }
 0x1bb   :  { %v3405_v42 = vpop.f32.mrf.mxu1 }
 0x1bd   :  { %v2619_v43 = vpop.f32.mrf.mxu1 }
 0x1be   :  { %v306_v18 = vmax.f32 %v2619_v43, 0.0  ;;  %v3529_v43 = vmul.f32 %v302_v33, %v3514_v35 }
 0x1bf   :  { %v253_v44 = vpop.f32.mrf.mxu1 }
 0x1c0   :  { %v304_v26 = vmax.f32 %v253_v44, 0.0  ;;  %v3490_v27 = vmul.f32 %v306_v18, %v3477_v21  ;;  %v301_v44 = vmax.f32 %v3405_v42, 0.0  ;;  %v2866_v42 = vld [vmem:[%s4567_s4] sm:$0xff]  }
 0x1c1   :  { %v2620_v45 = vpop.f32.mrf.mxu1  ;;  %2629 = vmatprep.subr.bf16.mxu0 %v2866_v42 }
 0x1c2   :  { %v307_v22 = vmax.f32 %v2620_v45, 0.0  ;;  %v3509_v34 = vmul.f32 %v304_v26, %v3495_v29  ;;  %v3539_v45 = vmul.f32 %v303_v36, %v3524_v38  ;;  %2630 = vmatpush3.bf16.msra.mxu0 %v2866_v42 }
 0x1c3   :  { %v256_v46 = vpop.f32.mrf.mxu1 }
 0x1c4   :  { %v305_v30 = vmax.f32 %v256_v46, 0.0  ;;  %v3499_v31 = vmul.f32 %v307_v22, %v3486_v25  ;;  %v3548_v46 = vmul.f32 %v300_v39, %v3534_v41 }
 0x1c5   :  { %v2623_v47 = vpop.f32.mrf.mxu1  ;;  %2632 = vmatmul.mubr.msk.bf16.vlgmr.msra.gmra.mxu0 %vm81_vm0, %v3376_v28 }
 0x1c6   :  { %v310_v1 = vmax.f32 %v2623_v47, 0.0  ;;  %v3519_v37 = vmul.f32 %v305_v30, %v3504_v32  ;;  %v3552_v47 = vmul.f32 %v301_v44, %v3544_v40  ;;  %2635 = vmatprep.mubr.msk.bf16.mxu0 %vm81_vm0, %v3364_v24 }
 0x1c7   :  { %v269_v48 = vpop.f32.mrf.mxu1 }
 0x1c8   :  { %v308_v10 = vmax.f32 %v269_v48, 0.0  ;;  %v3454_v11 = vmul.f32 %v310_v1, %v3441_v4 }
 0x1c9   :  { %v2624_v49 = vpop.f32.mrf.mxu1 }
 0x1ca   :  { %v311_v6 = vmax.f32 %v2624_v49, 0.0  ;;  %v3472_v19 = vmul.f32 %v308_v10, %v3459_v13 }
 0x1cb   :  { %v272_v50 = vpop.f32.mrf.mxu1 }
 0x1cc   :  { %v309_v14 = vmax.f32 %v272_v50, 0.0  ;;  %v3463_v15 = vmul.f32 %v311_v6, %v3450_v9 }
 0x1cd   :  { %v2627_v51 = vpop.f32.mrf.mxu1  ;;  %2636 = vmatmul.mubr.msk.bf16.gmra.mxu0 %vm81_vm0, %v3352_v20 }
 0x1ce   :  { %v314_v53 = vmax.f32 %v2627_v51, 0.0  ;;  %v3481_v23 = vmul.f32 %v309_v14, %v3468_v17  ;;  %2639 = vmatprep.mubr.msk.bf16.mxu0 %vm81_vm0, %v3340_v16 }
 0x1cf   :  { %v285_v54 = vpop.f32.mrf.mxu1 }
 0x1d0   :  { %v312_v56 = vmax.f32 %v285_v54, 0.0  ;;  %v3418_v57 = vmul.f32 %v314_v53, %v3410_v52 }
 0x1d1   :  { %v2628_v58 = vpop.f32.mrf.mxu1 }
 0x1d2   :  { %v315_v60 = vmax.f32 %v2628_v58, 0.0  ;;  %360 = vmax.xlane.f32.xlu0 %v3418_v57  ;;  %v3427_v61 = vmul.f32 %v312_v56, %v3415_v55 }
 0x1d3   :  { %v288_v62 = vpop.f32.mrf.mxu1 }
 0x1d4   :  { %v313_v2 = vmax.f32 %v288_v62, 0.0  ;;  %356 = vmax.xlane.f32.xlu1 %v3427_v61  ;;  %v3436_v3 = vmul.f32 %v315_v60, %v3423_v59 }
 0x1d5   :  { %2640 = vmatmul.mubr.msk.bf16.gmra.mxu0 %vm81_vm0, %v3328_v12 }
 0x1d6   :  { %362 = vmax.xlane.f32.xlu0 %v3436_v3  ;;  %v3445_v8 = vmul.f32 %v313_v2, %v3432_v63  ;;  %2643 = vmatprep.mubr.msk.bf16.mxu0 %vm81_vm0, %v3310_v7 }
 0x1d8   :  { %358 = vmax.xlane.f32.xlu1 %v3445_v8 }
 0x1da   :  { %352 = vmax.xlane.f32.xlu0 %v3454_v11 }
 0x1dc   :  { %354 = vmax.xlane.f32.xlu1 %v3463_v15 }
 0x1dd   :  { %2644 = vmatmul.mubr.msk.bf16.gmra.mxu0 %vm81_vm0, %v3305_v5 }
 0x1de   :  { %348 = vmax.xlane.f32.xlu0 %v3472_v19 }
 0x1e0   :  { %350 = vmax.xlane.f32.xlu1 %v3481_v23 }
 0x1e2   :  { %344 = vmax.xlane.f32.xlu0 %v3490_v27 }
 0x1e4   :  { %346 = vmax.xlane.f32.xlu1 %v3499_v31 }
 0x1e6   :  { %340 = vmax.xlane.f32.xlu0 %v3509_v34 }
 0x1e8   :  { %342 = vmax.xlane.f32.xlu1 %v3519_v37 }
 0x1ea   :  { %336 = vmax.xlane.f32.xlu0 %v3529_v43 }
 0x1ec   :  { %338 = vmax.xlane.f32.xlu1 %v3539_v45 }
 0x1ee   :  { %332 = vmax.xlane.f32.xlu0 %v3548_v46 }
 0x1f0   :  { %334 = vmax.xlane.f32.xlu1 %v3552_v47 }
 0x25b   :  { %v361_v48 = vpop.xlane.xlu0 %360 }
 0x25c   :  { %v378_v28 = vsub.f32 %v3418_v57, %v361_v48 }
 0x25d   :  { %v357_v49 = vpop.xlane.xlu1 %356 }
 0x25e   :  { %v408_v24 = vmul.f32 1.442695, %v378_v28  ;;  %v376_v50 = vsub.f32 %v3427_v61, %v357_v49 }
 0x25f   :  { %v363_v20 = vpop.xlane.xlu0 %362 }
 0x260   :  { %2872 = vpow2.f32 %v408_v24  ;;  %v404_v51 = vmul.f32 1.442695, %v376_v50  ;;  %v379_v16 = vsub.f32 %v3436_v3, %v363_v20 }
 0x261   :  { %v359_v53 = vpop.xlane.xlu1 %358 }
 0x262   :  { %2874 = vpow2.f32 %v404_v51  ;;  %v410_v12 = vmul.f32 1.442695, %v379_v16  ;;  %v377_v7 = vsub.f32 %v3445_v8, %v359_v53 }
 0x263   :  { %v353_v54 = vpop.xlane.xlu0 %352 }
 0x264   :  { %2876 = vpow2.f32 %v410_v12  ;;  %v406_v5 = vmul.f32 1.442695, %v377_v7  ;;  %v374_v56 = vsub.f32 %v3454_v11, %v353_v54 }
 0x265   :  { %v355_v57 = vpop.xlane.xlu1 %354 }
 0x266   :  { %2878 = vpow2.f32 %v406_v5  ;;  %v400_v58 = vmul.f32 1.442695, %v374_v56  ;;  %v375_v60 = vsub.f32 %v3463_v15, %v355_v57 }
 0x267   :  { %v349_v61 = vpop.xlane.xlu0 %348 }
 0x268   :  { %2880 = vpow2.f32 %v400_v58  ;;  %v402_v62 = vmul.f32 1.442695, %v375_v60  ;;  %v372_v1 = vsub.f32 %v3472_v19, %v349_v61 }
 0x269   :  { %v351_v2 = vpop.xlane.xlu1 %350 }
 0x26a   :  { %2882 = vpow2.f32 %v402_v62  ;;  %v396_v3 = vmul.f32 1.442695, %v372_v1  ;;  %v373_v6 = vsub.f32 %v3481_v23, %v351_v2 }
 0x26b   :  { %v345_v8 = vpop.xlane.xlu0 %344 }
 0x26c   :  { %2884 = vpow2.f32 %v396_v3  ;;  %v398_v10 = vmul.f32 1.442695, %v373_v6  ;;  %v370_v11 = vsub.f32 %v3490_v27, %v345_v8 }
 0x26d   :  { %v2873_v14 = vpop.eup %2872  ;;  %v347_v18 = vpop.xlane.xlu1 %346 }
 0x26e   :  { %2886 = vpow2.f32 %v398_v10  ;;  %v392_v22 = vmul.f32 1.442695, %v370_v11  ;;  %v371_v15 = vsub.f32 %v3499_v31, %v347_v18  ;;  %v3583_v26 = vmul.f32 %v2873_v14, %v3410_v52 }
 0x26f   :  { %v2875_v19 = vpop.eup %2874  ;;  %v341_v30 = vpop.xlane.xlu0 %340 }
 0x270   :  { %2888 = vpow2.f32 %v392_v22  ;;  %v394_v33 = vmul.f32 1.442695, %v371_v15  ;;  %v368_v23 = vsub.f32 %v3509_v34, %v341_v30  ;;  %456 = vadd.xlane.f32.xlu0 %v3583_v26  ;;  %v3588_v27 = vmul.f32 %v2875_v19, %v3415_v55  ;;  %v506_v22 = vld [vmem:[#allocation3 + $0x70] sm:$0xff] }
 0x271   :  { %v2877_v36 = vpop.eup %2876  ;;  %v343_v39 = vpop.xlane.xlu1 %342 }
 0x272   :  { %2890 = vpow2.f32 %v394_v33  ;;  %v388_v44 = vmul.f32 1.442695, %v368_v23  ;;  %v369_v31 = vsub.f32 %v3519_v37, %v343_v39  ;;  %v3592_v52 = vmul.f32 %v2877_v36, %v3423_v59 }
 0x273   :  { %v2879_v42 = vpop.eup %2878  ;;  %v337_v48 = vpop.xlane.xlu0 %336 }
 0x274   :  { %2892 = vpow2.f32 %v388_v44  ;;  %v390_v28 = vmul.f32 1.442695, %v369_v31  ;;  %v366_v34 = vsub.f32 %v3529_v43, %v337_v48  ;;  %458 = vadd.xlane.f32.xlu1 %v3592_v52  ;;  %452 = vadd.xlane.f32.xlu0 %v3588_v27  ;;  %v3598_v24 = vmul.f32 %v2879_v42, %v3432_v63  ;;  %v507_v44 = vld [vmem:[#allocation3 + $0x78] sm:$0xff]  ;;  %v504_v42 = vld [vmem:[#allocation3 + $0x60] sm:$0xff] }
 0x275   :  { %v2881_v49 = vpop.eup %2880  ;;  %v339_v55 = vpop.xlane.xlu1 %338 }
 0x276   :  { %2894 = vpow2.f32 %v390_v28  ;;  %v384_v37 = vmul.f32 1.442695, %v366_v34  ;;  %v367_v59 = vsub.f32 %v3539_v45, %v339_v55  ;;  %v3602_v50 = vmul.f32 %v2881_v49, %v3441_v4 }
 0x277   :  { %v2883_v20 = vpop.eup %2882  ;;  %v333_v51 = vpop.xlane.xlu0 %332 }
 0x278   :  { %2896 = vpow2.f32 %v384_v37  ;;  %v386_v43 = vmul.f32 1.442695, %v367_v59  ;;  %v364_v16 = vsub.f32 %v3548_v46, %v333_v51  ;;  %454 = vadd.xlane.f32.xlu1 %v3598_v24  ;;  %448 = vadd.xlane.f32.xlu0 %v3602_v50  ;;  %v3608_v12 = vmul.f32 %v2883_v20, %v3450_v9  ;;  %v505_v20 = vld [vmem:[#allocation3 + $0x68] sm:$0xff] }
 0x279   :  { %v2885_v53 = vpop.eup %2884  ;;  %v335_v63 = vpop.xlane.xlu1 %334 }
 0x27a   :  { %2898 = vpow2.f32 %v386_v43  ;;  %v380_v45 = vmul.f32 1.442695, %v364_v16  ;;  %v365_v4 = vsub.f32 %v3552_v47, %v335_v63  ;;  %v3612_v7 = vmul.f32 %v2885_v53, %v3459_v13  ;;  %v502_v16 = vld [vmem:[#allocation3 + $0x50] sm:$0xff] }
 0x27b   :  { %v2887_v54 = vpop.eup %2886 }
 0x27c   :  { %2900 = vpow2.f32 %v380_v45  ;;  %v382_v5 = vmul.f32 1.442695, %v365_v4  ;;  %450 = vadd.xlane.f32.xlu1 %v3608_v12  ;;  %444 = vadd.xlane.f32.xlu0 %v3612_v7  ;;  %v3617_v56 = vmul.f32 %v2887_v54, %v3468_v17 }
 0x27d   :  { %v2889_v46 = vpop.eup %2888 }
 0x27e   :  { %2902 = vpow2.f32 %v382_v5  ;;  %v3620_v9 = vmul.f32 %v2889_v46, %v3477_v21  ;;  %v503_v46 = vld [vmem:[#allocation3 + $0x58] sm:$0xff] }
 0x27f   :  { %v2891_v57 = vpop.eup %2890 }
 0x280   :  { %446 = vadd.xlane.f32.xlu1 %v3617_v56  ;;  %440 = vadd.xlane.f32.xlu0 %v3620_v9  ;;  %v3625_v47 = vmul.f32 %v2891_v57, %v3486_v25 }
 0x281   :  { %v2893_v13 = vpop.eup %2892 }
 0x282   :  { %v3628_v58 = vmul.f32 %v2893_v13, %v3495_v29 }
 0x283   :  { %v2895_v60 = vpop.eup %2894 }
 0x284   :  { %442 = vadd.xlane.f32.xlu1 %v3625_v47  ;;  %436 = vadd.xlane.f32.xlu0 %v3628_v58  ;;  %v3633_v21 = vmul.f32 %v2895_v60, %v3504_v32 }
 0x285   :  { %v2897_v17 = vpop.eup %2896 }
 0x286   :  { %v3636_v61 = vmul.f32 %v2897_v17, %v3514_v35  ;;  %v500_v17 = vld [vmem:[#allocation3 + $0x40] sm:$0xff] }
 0x287   :  { %v2899_v62 = vpop.eup %2898 }
 0x288   :  { %438 = vadd.xlane.f32.xlu1 %v3633_v21  ;;  %432 = vadd.xlane.f32.xlu0 %v3636_v61  ;;  %v3641_v29 = vmul.f32 %v2899_v62, %v3524_v38 }
 0x289   :  { %v2901_v25 = vpop.eup %2900 }
 0x28a   :  { %v3644_v1 = vmul.f32 %v2901_v25, %v3534_v41 }
 0x28b   :  { %v2903_v2 = vpop.eup %2902 }
 0x28c   :  { %434 = vadd.xlane.f32.xlu1 %v3641_v29  ;;  %428 = vadd.xlane.f32.xlu0 %v3644_v1  ;;  %v3649_v32 = vmul.f32 %v2903_v2, %v3544_v40 }
 0x290   :  { %430 = vadd.xlane.f32.xlu1 %v3649_v32 }
 0x2f9   :  { %v457_v35 = vpop.xlane.xlu0 %456 }
 0x2fa   :  { %2904 = vrcp.f32 %v457_v35 }
 0x2fd   :  { %v459_v3 = vpop.xlane.xlu1 %458  ;;  %v453_v6 = vpop.xlane.xlu0 %452 }
 0x2fe   :  { %2906 = vrcp.f32 %v459_v3 }
 0x2ff   :  { %2908 = vrcp.f32 %v453_v6  ;;  %v501_v6 = vld [vmem:[#allocation3 + $0x48] sm:$0xff] }
 0x301   :  { %v455_v38 = vpop.xlane.xlu1 %454  ;;  %v449_v8 = vpop.xlane.xlu0 %448 }
 0x302   :  { %2910 = vrcp.f32 %v455_v38 }
 0x303   :  { %2912 = vrcp.f32 %v449_v8 }
 0x305   :  { %v451_v41 = vpop.xlane.xlu1 %450  ;;  %v445_v10 = vpop.xlane.xlu0 %444 }
 0x306   :  { %2914 = vrcp.f32 %v451_v41 }
 0x307   :  { %v2905_v11 = vpop.eup %2904  ;;  %2916 = vrcp.f32 %v445_v10  ;;  %v498_v10 = vld [vmem:[#allocation3 + $0x30] sm:$0xff] }
 0x308   :  { %v489_v40 = vmul.f32 %v2905_v11, %v3583_v26 }
 0x309   :  { %v447_v14 = vpop.xlane.xlu1 %446  ;;  %v441_v18 = vpop.xlane.xlu0 %440 }
 0x30a   :  { %2918 = vrcp.f32 %v447_v14  ;;  %v522_v15 = vmul.f32 0.4, %v489_v40 }
 0x30b   :  { %v2907_v19 = vpop.eup %2906  ;;  %2920 = vrcp.f32 %v441_v18 }
 0x30c   :  { %v2909_v30 = vpop.eup %2908  ;;  %v3653_v33 = vadd.f32 %v522_v15, %v506_v22  ;;  %v491_v23 = vmul.f32 %v2907_v19, %v3592_v52 }
 0x30d   :  { %v443_v36 = vpop.xlane.xlu1 %442  ;;  %v437_v39 = vpop.xlane.xlu0 %436  ;;  %v485_v31 = vmul.f32 %v2909_v30, %v3588_v27 }
 0x30e   :  { %2922 = vrcp.f32 %v443_v36  ;;  %568 = vadd.xlane.f32.xlu0 %v3653_v33  ;;  %v523_v26 = vmul.f32 0.4, %v491_v23  ;;  %v496_v23 = vld [vmem:[#allocation3 + $0x20] sm:$0xff] }
 0x30f   :  { %v2911_v48 = vpop.eup %2910  ;;  %2924 = vrcp.f32 %v437_v39  ;;  %v520_v28 = vmul.f32 0.4, %v485_v31 }
 0x310   :  { %v2913_v34 = vpop.eup %2912  ;;  %v3658_v49 = vadd.f32 %v523_v26, %v507_v44  ;;  %v487_v55 = vmul.f32 %v2911_v48, %v3598_v24 }
 0x311   :  { %v439_v37 = vpop.xlane.xlu1 %438  ;;  %v433_v52 = vpop.xlane.xlu0 %432  ;;  %v3661_v59 = vadd.f32 %v520_v28, %v504_v42  ;;  %v481_v27 = vmul.f32 %v2913_v34, %v3602_v50  ;;  %v497_v42 = vld [vmem:[#allocation3 + $0x28] sm:$0xff]  ;;  %v494_v34 = vld [vmem:[#allocation3 + $0x10] sm:$0xff] }
 0x312   :  { %2926 = vrcp.f32 %v439_v37  ;;  %570 = vadd.xlane.f32.xlu1 %v3658_v49  ;;  %v748_v51 = vpack.c.bf16 %v3658_v49, %v3653_v33  ;;  %v521_v43 = vmul.f32 0.4, %v487_v55 }
 0x313   :  { %v2915_v53 = vpop.eup %2914  ;;  %2928 = vrcp.f32 %v433_v52  ;;  %564 = vadd.xlane.f32.xlu0 %v3661_v59  ;;  %v518_v24 = vmul.f32 0.4, %v481_v27 }
 0x314   :  { %v2917_v63 = vpop.eup %2916  ;;  %v3668_v45 = vadd.f32 %v521_v43, %v505_v20  ;;  %v483_v4 = vmul.f32 %v2915_v53, %v3608_v12  ;;  %v495_v43 = vld [vmem:[#allocation3 + $0x18] sm:$0xff] }
 0x315   :  { %v435_v54 = vpop.xlane.xlu1 %434  ;;  %v429_v50 = vpop.xlane.xlu0 %428  ;;  %v3671_v5 = vadd.f32 %v518_v24, %v502_v16  ;;  %v477_v57 = vmul.f32 %v2917_v63, %v3612_v7  ;;  %v492_v24 = vld [vmem:[#allocation3] sm:$0xff] }
 0x316   :  { %2930 = vrcp.f32 %v435_v54  ;;  %566 = vadd.xlane.f32.xlu1 %v3668_v45  ;;  %v747_v13 = vpack.c.bf16 %v3668_v45, %v3661_v59  ;;  %v519_v60 = vmul.f32 0.4, %v483_v4 }
 0x317   :  { %v2919_v62 = vpop.eup %2918  ;;  %2932 = vrcp.f32 %v429_v50  ;;  %560 = vadd.xlane.f32.xlu0 %v3671_v5  ;;  %v516_v12 = vmul.f32 0.4, %v477_v57 }
 0x318   :  { %v2921_v25 = vpop.eup %2920  ;;  %v3678_v2 = vadd.f32 %v519_v60, %v503_v46  ;;  %v479_v35 = vmul.f32 %v2919_v62, %v3617_v56  ;;  %v493_v46 = vld [vmem:[#allocation3 + $0x8] sm:$0xff] }
 0x319   :  { %v431_v3 = vpop.xlane.xlu1 %430  ;;  %v3681_v7 = vadd.f32 %v516_v12, %v500_v17  ;;  %v473_v38 = vmul.f32 %v2921_v25, %v3620_v9  ;;  %v499_v9 = vld [vmem:[#allocation3 + $0x38] sm:$0xff]  ;;  %v2868_v62 = vld [vmem:[#allocation8] sm:$0xff]   ;;  %v3724_v12 = vpop.f32.mrf.mxu0 }
 0x31a   :  { %2934 = vrcp.f32 %v431_v3  ;;  %562 = vadd.xlane.f32.xlu1 %v3678_v2  ;;  %v746_v8 = vpack.c.bf16 %v3678_v2, %v3671_v5  ;;  %v517_v41 = vmul.f32 0.4, %v479_v35  ;;  %2697 = vmatprep.subr.bf16.mxu1 %v2868_v62 }
 0x31b   :  { %v2923_v11 = vpop.eup %2922  ;;  %556 = vadd.xlane.f32.xlu0 %v3681_v7  ;;  %v514_v40 = vmul.f32 0.4, %v473_v38  ;;  %2698 = vmatpush3.bf16.msra.mxu1 %v2868_v62  ;;  %v3726_v25 = vpop.f32.mrf.mxu0 }
 0x31c   :  { %v2925_v14 = vpop.eup %2924  ;;  %v3688_v56 = vadd.f32 %v517_v41, %v501_v6  ;;  %v475_v18 = vmul.f32 %v2923_v11, %v3625_v47 }
 0x31d   :  { %v3691_v22 = vadd.f32 %v514_v40, %v498_v10  ;;  %v469_v15 = vmul.f32 %v2925_v14, %v3628_v58 }
 0x31e   :  { %558 = vadd.xlane.f32.xlu1 %v3688_v56  ;;  %v745_v19 = vpack.c.bf16 %v3688_v56, %v3681_v7  ;;  %v515_v30 = vmul.f32 0.4, %v475_v18  ;;  %v3838_v7 = vld [vmem:[%s4568_s5] ss:$0 sm:$0xff] }
 0x31f   :  { %v2927_v36 = vpop.eup %2926  ;;  %552 = vadd.xlane.f32.xlu0 %v3691_v22  ;;  %v512_v39 = vmul.f32 0.4, %v469_v15 }
 0x320   :  { %v2929_v44 = vpop.eup %2928  ;;  %v3698_v31 = vadd.f32 %v515_v30, %v499_v9  ;;  %v471_v47 = vmul.f32 %v2927_v36, %v3633_v21 }
 0x321   :  { %v3701_v26 = vadd.f32 %v512_v39, %v496_v23  ;;  %v465_v58 = vmul.f32 %v2929_v44, %v3636_v61 }
 0x322   :  { %554 = vadd.xlane.f32.xlu1 %v3698_v31  ;;  %v744_v48 = vpack.c.bf16 %v3698_v31, %v3691_v22  ;;  %v513_v28 = vmul.f32 0.4, %v471_v47 }
 0x323   :  { %v2931_v55 = vpop.eup %2930  ;;  %548 = vadd.xlane.f32.xlu0 %v3701_v26  ;;  %v510_v37 = vmul.f32 0.4, %v465_v58 }
 0x324   :  { %v2933_v52 = vpop.eup %2932  ;;  %v3708_v20 = vadd.f32 %v513_v28, %v497_v42  ;;  %v467_v21 = vmul.f32 %v2931_v55, %v3641_v29 }
 0x325   :  { %v3711_v27 = vadd.f32 %v510_v37, %v494_v34  ;;  %v461_v61 = vmul.f32 %v2933_v52, %v3644_v1 }
 0x326   :  { %550 = vadd.xlane.f32.xlu1 %v3708_v20  ;;  %v743_v16 = vpack.c.bf16 %v3708_v20, %v3701_v26  ;;  %v511_v53 = vmul.f32 0.4, %v467_v21  ;;  %v941_v26 = vld [vmem:[#allocation2 + $0x10] sm:$0xff]  ;;  %v942_v20 = vld [vmem:[#allocation2 + $0x18] sm:$0xff] }
 0x327   :  { %v2935_v63 = vpop.eup %2934  ;;  %544 = vadd.xlane.f32.xlu0 %v3711_v27  ;;  %v508_v4 = vmul.f32 0.4, %v461_v61  ;;  %v957_v22 = vpack.c.bf16 %v942_v20, %v941_v26  ;;  %v3084_v20 = vld [vmem:[#allocation6] sm:$0xff]  }
 0x328   :  { %v3718_v54 = vadd.f32 %v511_v53, %v495_v43  ;;  %v463_v29 = vmul.f32 %v2935_v63, %v3649_v32  ;;  %v3728_v32 = vpop.f32.mrf.mxu0 }
 0x329   :  { %v524_v50 = vadd.f32 %v508_v4, %v492_v24  ;;  %2699 = vmatprep.mubr.msk.bf16.mxu1 %vm81_vm0, %v957_v22 }
 0x32a   :  { %546 = vadd.xlane.f32.xlu1 %v3718_v54  ;;  %v742_v1 = vpack.c.bf16 %v3718_v54, %v3711_v27  ;;  %v509_v57 = vmul.f32 0.4, %v463_v29  ;;  %v3730_v35 = vpop.f32.mrf.mxu0 }
 0x32b   :  { %540 = vadd.xlane.f32.xlu0 %v524_v50 }
 0x32c   :  { %v525_v60 = vadd.f32 %v509_v57, %v493_v46  ;;  %v3732_v3 = vpop.f32.mrf.mxu0 }
 0x32e   :  { %542 = vadd.xlane.f32.xlu1 %v525_v60  ;;  %v741_v17 = vpack.c.bf16 %v525_v60, %v524_v50  ;;  %v3734_v6 = vpop.f32.mrf.mxu0 }
 0x330   :  { %2663 = vmatprep.mubr.bf16.mxu0 %v741_v17  ;;  %v3736_v38 = vpop.f32.mrf.mxu0 }
 0x332   :  { %v3738_v41 = vpop.f32.mrf.mxu0 }
 0x334   :  { %v3740_v10 = vpop.f32.mrf.mxu0 }
 0x336   :  { %v3742_v14 = vpop.f32.mrf.mxu0 }
 0x338   :  { %v3744_v30 = vpop.f32.mrf.mxu0 }
 0x33a   :  { %v3746_v47 = vpop.f32.mrf.mxu0 }
 0x33c   :  { %v2645_v28 = vpop.f32.mrf.mxu0 }
 0x33e   :  { %v726_v43 = vpop.f32.mrf.mxu0 }
 0x340   :  { %v2646_v57 = vpop.f32.mrf.mxu0 }
 0x397   :  { %v569_v11 = vpop.xlane.xlu0 %568 }
 0x398   :  { %v602_v40 = vmax.f32 %v569_v11, 1e-12  ;;  %vm586_vm2 = vcmp.gt.f32.partialorder %v569_v11, 0.0 }
 0x39a   :  { %2936 = vrsqrt.f32 %v602_v40 }
 0x39b   :  { %v571_v18 = vpop.xlane.xlu1 %570 }
 0x39c   :  { %v603_v9 = vmax.f32 %v571_v18, 1e-12  ;;  %v565_v15 = vpop.xlane.xlu0 %564  ;;  %vm587_vm3 = vcmp.gt.f32.partialorder %v571_v18, 0.0 }
 0x39d   :  { %v600_v23 = vmax.f32 %v565_v15, 1e-12  ;;  %vm584_vm4 = vcmp.gt.f32.partialorder %v565_v15, 0.0 }
 0x39e   :  { %2938 = vrsqrt.f32 %v603_v9 }
 0x39f   :  { %2940 = vrsqrt.f32 %v600_v23  ;;  %v567_v36 = vpop.xlane.xlu1 %566 }
 0x3a0   :  { %v601_v39 = vmax.f32 %v567_v36, 1e-12  ;;  %v561_v44 = vpop.xlane.xlu0 %560  ;;  %vm585_vm5 = vcmp.gt.f32.partialorder %v567_v36, 0.0 }
 0x3a1   :  { %v598_v42 = vmax.f32 %v561_v44, 1e-12  ;;  %vm582_vm6 = vcmp.gt.f32.partialorder %v561_v44, 0.0 }
 0x3a2   :  { %2942 = vrsqrt.f32 %v601_v39 }
 0x3a3   :  { %2944 = vrsqrt.f32 %v598_v42  ;;  %v563_v58 = vpop.xlane.xlu1 %562 }
 0x3a4   :  { %v599_v34 = vmax.f32 %v563_v58, 1e-12  ;;  %v557_v55 = vpop.xlane.xlu0 %556  ;;  %vm583_vm7 = vcmp.gt.f32.partialorder %v563_v58, 0.0 }
 0x3a5   :  { %v596_v37 = vmax.f32 %v557_v55, 1e-12  ;;  %vm580_vm8 = vcmp.gt.f32.partialorder %v557_v55, 0.0 }
 0x3a6   :  { %2946 = vrsqrt.f32 %v599_v34 }
 0x3a7   :  { %v2937_v52 = vpop.eup %2936  ;;  %2948 = vrsqrt.f32 %v596_v37  ;;  %v3748_v21 = vpop.xlane.xlu1 %558 }
 0x3a8   :  { %v597_v61 = vmax.f32 %v3748_v21, 1e-12  ;;  %v3751_v53 = vpop.xlane.xlu0 %552  ;;  %v3754_v63 = vsel %vm586_vm2, %v2937_v52, 0.0  ;;  %v729_v37 = vpop.f32.mrf.mxu0  ;;  %vm581_vm9 = vcmp.gt.f32.partialorder %v3748_v21, 0.0 }
 0x3a9   :  { %v594_v24 = vmax.f32 %v3751_v53, 1e-12  ;;  %v763_v62 = vmul.f32 %v2645_v28, %v3754_v63  ;;  %vm578_vm10 = vcmp.gt.f32.partialorder %v3751_v53, 0.0 }
 0x3aa   :  { %2950 = vrsqrt.f32 %v597_v61 }
 0x3ab   :  { %v2939_v4 = vpop.eup %2938  ;;  %2952 = vrsqrt.f32 %v594_v24  ;;  %v3756_v29 = vpop.xlane.xlu1 %554 }
 0x3ac   :  { %v2941_v50 = vpop.eup %2940  ;;  %v3758_v46 = vsel %vm587_vm3, %v2939_v4, 0.0  ;;  %v595_v60 = vmax.f32 %v3756_v29, 1e-12  ;;  %v3761_v17 = vpop.xlane.xlu0 %548  ;;  %vm579_vm11 = vcmp.gt.f32.partialorder %v3756_v29, 0.0 }
 0x3ad   :  { %v764_v11 = vmul.f32 %v2646_v57, %v3758_v46  ;;  %v592_v40 = vmax.f32 %v3761_v17, 1e-12  ;;  %v3766_v9 = vsel %vm584_vm4, %v2941_v50, 0.0  ;;  %vm576_vm12 = vcmp.gt.f32.partialorder %v3761_v17, 0.0 }
 0x3ae   :  { %2954 = vrsqrt.f32 %v595_v60  ;;  %v761_v28 = vmul.f32 %v726_v43, %v3766_v9 }
 0x3af   :  { %v2943_v18 = vpop.eup %2942  ;;  %v772_v23 = vpack.c.bf16 %v764_v11, %v763_v62  ;;  %2956 = vrsqrt.f32 %v592_v40  ;;  %v551_v39 = vpop.xlane.xlu1 %550 }
 0x3b0   :  { %v2945_v42 = vpop.eup %2944  ;;  %v3768_v34 = vsel %vm585_vm5, %v2943_v18, 0.0  ;;  %v593_v52 = vmax.f32 %v551_v39, 1e-12  ;;  %v545_v15 = vpop.xlane.xlu0 %544  ;;  %vm577_vm13 = vcmp.gt.f32.partialorder %v551_v39, 0.0 }
 0x3b1   :  { %v762_v61 = vmul.f32 %v729_v37, %v3768_v34  ;;  %v590_v24 = vmax.f32 %v545_v15, 1e-12  ;;  %2647 = vmatprep.subr.bf16.mxu0 %v772_v23  ;;  %v3772_v4 = vsel %vm582_vm6, %v2945_v42, 0.0  ;;  %vm574_vm14 = vcmp.gt.f32.partialorder %v545_v15, 0.0 }
 0x3b2   :  { %2958 = vrsqrt.f32 %v593_v52  ;;  %2648 = vmatpush3.bf16.msra.mxu0 %v772_v23  ;;  %v759_v43 = vmul.f32 %v3740_v10, %v3772_v4 }
 0x3b3   :  { %v2947_v36 = vpop.eup %2946  ;;  %v771_v50 = vpack.c.bf16 %v762_v61, %v761_v28  ;;  %2960 = vrsqrt.f32 %v590_v24  ;;  %v547_v57 = vpop.xlane.xlu1 %546 }
 0x3b4   :  { %v2949_v60 = vpop.eup %2948  ;;  %v3774_v62 = vsel %vm583_vm7, %v2947_v36, 0.0  ;;  %v591_v11 = vmax.f32 %v547_v57, 1e-12  ;;  %v541_v44 = vpop.xlane.xlu0 %540  ;;  %vm575_vm15 = vcmp.gt.f32.partialorder %v547_v57, 0.0 }
 0x3b5   :  { %v760_v40 = vmul.f32 %v3744_v30, %v3774_v62  ;;  %v588_v18 = vmax.f32 %v541_v44, 1e-12  ;;  %2649 = vmatprep.subr.bf16.mxu0 %v771_v50  ;;  %v3780_v23 = vsel %vm580_vm8, %v2949_v60, 0.0  ;;  %vm572_vm2 = vcmp.gt.f32.partialorder %v541_v44, 0.0 }
 0x3b6   :  { %2962 = vrsqrt.f32 %v591_v11  ;;  %2650 = vmatpush3.bf16.msra.mxu0 %v771_v50  ;;  %v757_v30 = vmul.f32 %v3742_v14, %v3780_v23 }
 0x3b7   :  { %v2951_v58 = vpop.eup %2950  ;;  %2964 = vrsqrt.f32 %v588_v18  ;;  %v543_v42 = vpop.xlane.xlu1 %542  ;;  %v770_v37 = vpack.c.bf16 %v760_v40, %v759_v43 }
 0x3b8   :  { %v2953_v52 = vpop.eup %2952  ;;  %v3783_v28 = vsel %vm581_vm9, %v2951_v58, 0.0  ;;  %v589_v10 = vmax.f32 %v543_v42, 1e-12  ;;  %vm573_vm3 = vcmp.gt.f32.partialorder %v543_v42, 0.0 }
 0x3b9   :  { %v758_v55 = vmul.f32 %v3746_v47, %v3783_v28  ;;  %2651 = vmatprep.subr.bf16.mxu0 %v770_v37  ;;  %v3790_v61 = vsel %vm578_vm10, %v2953_v52, 0.0 }
 0x3ba   :  { %2966 = vrsqrt.f32 %v589_v10  ;;  %2652 = vmatpush3.bf16.msra.mxu0 %v770_v37  ;;  %v755_v14 = vmul.f32 %v3732_v3, %v3790_v61 }
 0x3bb   :  { %v2955_v21 = vpop.eup %2954  ;;  %v769_v24 = vpack.c.bf16 %v758_v55, %v757_v30 }
 0x3bc   :  { %v2957_v36 = vpop.eup %2956  ;;  %v3793_v50 = vsel %vm579_vm11, %v2955_v21, 0.0  ;;  %v2867_v21 = vld [vmem:[#allocation8 + $0x8] sm:$0xff]  }
 0x3bd   :  { %v756_v47 = vmul.f32 %v3736_v38, %v3793_v50  ;;  %2653 = vmatprep.subr.bf16.mxu0 %v769_v24  ;;  %v3800_v53 = vsel %vm576_vm12, %v2957_v36, 0.0 }
 0x3be   :  { %2654 = vmatpush3.bf16.msra.mxu0 %v769_v24  ;;  %v753_v40 = vmul.f32 %v3734_v6, %v3800_v53 }
 0x3bf   :  { %v2959_v60 = vpop.eup %2958  ;;  %v768_v11 = vpack.c.bf16 %v756_v47, %v755_v14 }
 0x3c0   :  { %v2961_v29 = vpop.eup %2960  ;;  %v3802_v43 = vsel %vm577_vm13, %v2959_v60, 0.0 }
 0x3c1   :  { %v754_v3 = vmul.f32 %v3738_v41, %v3802_v43  ;;  %2655 = vmatprep.subr.bf16.mxu0 %v768_v11  ;;  %v622_v38 = vsel %vm574_vm14, %v2961_v29, 0.0 }
 0x3c2   :  { %2656 = vmatpush3.bf16.msra.mxu0 %v768_v11  ;;  %v751_v39 = vmul.f32 %v3724_v12, %v622_v38 }
 0x3c3   :  { %v2963_v17 = vpop.eup %2962  ;;  %v767_v18 = vpack.c.bf16 %v754_v3, %v753_v40 }
 0x3c4   :  { %v2965_v58 = vpop.eup %2964  ;;  %v623_v37 = vsel %vm575_vm15, %v2963_v17, 0.0 }
 0x3c5   :  { %v752_v52 = vmul.f32 %v3728_v32, %v623_v37  ;;  %2657 = vmatprep.subr.bf16.mxu0 %v767_v18  ;;  %v620_v10 = vsel %vm572_vm2, %v2965_v58, 0.0 }
 0x3c6   :  { %2658 = vmatpush3.bf16.msra.mxu0 %v767_v18  ;;  %v749_v30 = vmul.f32 %v3726_v25, %v620_v10 }
 0x3c7   :  { %v2967_v6 = vpop.eup %2966  ;;  %v766_v41 = vpack.c.bf16 %v752_v52, %v751_v39 }
 0x3c8   :  { %v621_v15 = vsel %vm573_vm3, %v2967_v6, 0.0 }
 0x3c9   :  { %v750_v55 = vmul.f32 %v3730_v35, %v621_v15  ;;  %2659 = vmatprep.subr.bf16.mxu0 %v766_v41 }
 0x3ca   :  { %2660 = vmatpush3.bf16.msra.mxu0 %v766_v41 }
 0x3cb   :  { %v765_v57 = vpack.c.bf16 %v750_v55, %v749_v30 }
 0x3cd   :  { %2661 = vmatprep.subr.bf16.mxu0 %v765_v57 }
 0x3ce   :  { %2662 = vmatpush3.bf16.msra.mxu0 %v765_v57 }
 0x3cf   :  { %2679 = vmatprep.subr.bf16.mxu0 %v2867_v21 }
 0x3d1   :  { %2664 = vmatmul.mubr.bf16.vlgmr.msra.gmra.mxu0 %v742_v1 }
 0x3d2   :  { %2667 = vmatprep.mubr.bf16.mxu0 %v743_v16  ;;  %2680 = vmatpush3.bf16.msra.mxu0 %v2867_v21 }
 0x3d3   :  { %2715 = vmatprep.subr.bf16.mxu0 %v3210_v0 }
 0x3d9   :  { %2668 = vmatmul.mubr.bf16.gmra.mxu0 %v744_v48 }
 0x3da   :  { %2671 = vmatprep.mubr.bf16.mxu0 %v745_v19 }
 0x3e1   :  { %2672 = vmatmul.mubr.bf16.gmra.mxu0 %v746_v8 }
 0x3e2   :  { %2675 = vmatprep.mubr.bf16.mxu0 %v747_v13 }
 0x3e9   :  { %2676 = vmatmul.mubr.bf16.gmra.mxu0 %v748_v51 }
 0x491   :  { %v2665_v31 = vpop.f32.mrf.mxu0 }
 0x492   :  { %v872_v5 = vmul.f32 %v2665_v31, %v622_v38 }
 0x493   :  { %v807_v2 = vpop.f32.mrf.mxu0 }
 0x494   :  { %v895_v59 = vadd.f32 %v3838_v7, %v872_v5  ;;  %v870_v45 = vmul.f32 %v807_v2, %v620_v10 }
 0x495   :  { %v2666_v13 = vpop.f32.mrf.mxu0 }
 0x496   :  { %v911_v8 = vmax.f32 %v895_v59, 0.0  ;;  %v893_v33 = vadd.f32 %v3838_v7, %v870_v45  ;;  %v873_v49 = vmul.f32 %v2666_v13, %v623_v37 }
 0x497   :  { %v810_v51 = vpop.f32.mrf.mxu0 }
 0x498   :  { %927 = vst.msk [vmem:[#allocation2 + $0x30] sm:$0xff] %vm81_vm0, %v911_v8  ;;  %v909_v56 = vmax.f32 %v893_v33, 0.0  ;;  %v896_v19 = vadd.f32 %v3838_v7, %v873_v49  ;;  %v871_v48 = vmul.f32 %v810_v51, %v621_v15 }
 0x499   :  { %v2669_v27 = vpop.f32.mrf.mxu0 }
 0x49a   :  { %925 = vst.msk [vmem:[#allocation2 + $0x20] sm:$0xff] %vm81_vm0, %v909_v56  ;;  %v912_v16 = vmax.f32 %v896_v19, 0.0  ;;  %v894_v54 = vadd.f32 %v3838_v7, %v871_v48  ;;  %v876_v1 = vmul.f32 %v2669_v27, %v3790_v61 }
 0x49b   :  { %v823_v12 = vpop.f32.mrf.mxu0 }
 0x49c   :  { %928 = vst.msk [vmem:[#allocation2 + $0x38] sm:$0xff] %vm81_vm0, %v912_v16  ;;  %v910_v25 = vmax.f32 %v894_v54, 0.0  ;;  %v899_v32 = vadd.f32 %v3838_v7, %v876_v1  ;;  %v874_v35 = vmul.f32 %v823_v12, %v3800_v53 }
 0x49d   :  { %v2670_v44 = vpop.f32.mrf.mxu0 }
 0x49e   :  { %926 = vst.msk [vmem:[#allocation2 + $0x28] sm:$0xff] %vm81_vm0, %v910_v25  ;;  %v915_v42 = vmax.f32 %v899_v32, 0.0  ;;  %v897_v24 = vadd.f32 %v3838_v7, %v874_v35  ;;  %v877_v36 = vmul.f32 %v2670_v44, %v3793_v50 }
 0x49f   :  { %v826_v14 = vpop.f32.mrf.mxu0  ;;  %v945_v6 = vld [vmem:[#allocation2 + $0x30] sm:$0xff] }
 0x4a0   :  { %931 = vst.msk [vmem:[#allocation2 + $0x50] sm:$0xff] %vm81_vm0, %v915_v42  ;;  %v913_v61 = vmax.f32 %v897_v24, 0.0  ;;  %v900_v47 = vadd.f32 %v3838_v7, %v877_v36  ;;  %v875_v60 = vmul.f32 %v826_v14, %v3802_v43 }
 0x4a1   :  { %v2673_v11 = vpop.f32.mrf.mxu0  ;;  %v943_v37 = vld [vmem:[#allocation2 + $0x20] sm:$0xff] }
 0x4a2   :  { %929 = vst.msk [vmem:[#allocation2 + $0x40] sm:$0xff] %vm81_vm0, %v913_v61  ;;  %v916_v53 = vmax.f32 %v900_v47, 0.0  ;;  %v898_v29 = vadd.f32 %v3838_v7, %v875_v60  ;;  %v880_v40 = vmul.f32 %v2673_v11, %v3772_v4  ;;  %v3904_v61 = vld [vmem:[%s4567_s4 + $0x8] sm:$0xff]  }
 0x4a3   :  { %v839_v3 = vpop.f32.mrf.mxu0  ;;  %v946_v18 = vld [vmem:[#allocation2 + $0x38] sm:$0xff] }
 0x4a4   :  { %932 = vst.msk [vmem:[#allocation2 + $0x58] sm:$0xff] %vm81_vm0, %v916_v53  ;;  %v914_v50 = vmax.f32 %v898_v29, 0.0  ;;  %v903_v38 = vadd.f32 %v3838_v7, %v880_v40  ;;  %v878_v17 = vmul.f32 %v839_v3, %v3780_v23  ;;  %v959_v15 = vpack.c.bf16 %v946_v18, %v945_v6 }
 0x4a5   :  { %v2674_v58 = vpop.f32.mrf.mxu0  ;;  %v944_v43 = vld [vmem:[#allocation2 + $0x28] sm:$0xff] }
 0x4a6   :  { %930 = vst.msk [vmem:[#allocation2 + $0x48] sm:$0xff] %vm81_vm0, %v914_v50  ;;  %v919_v39 = vmax.f32 %v903_v38, 0.0  ;;  %v901_v52 = vadd.f32 %v3838_v7, %v878_v17  ;;  %v881_v10 = vmul.f32 %v2674_v58, %v3774_v62  ;;  %v958_v4 = vpack.c.bf16 %v944_v43, %v943_v37 }
 0x4a7   :  { %v842_v41 = vpop.f32.mrf.mxu0  ;;  %v949_v51 = vld [vmem:[#allocation2 + $0x50] sm:$0xff] }
 0x4a8   :  { %935 = vst.msk [vmem:[#allocation2 + $0x70] sm:$0xff] %vm81_vm0, %v919_v39  ;;  %v917_v30 = vmax.f32 %v901_v52, 0.0  ;;  %v904_v23 = vadd.f32 %v3838_v7, %v881_v10  ;;  %v879_v55 = vmul.f32 %v842_v41, %v3783_v28  ;;  %2681 = vmatprep.mubr.msk.bf16.mxu0 %vm81_vm0, %v958_v4  ;;  %2700 = vmatmul.mubr.msk.bf16.vlgmr.msra.gmra.mxu1 %vm81_vm0, %v958_v4 }
 0x4a9   :  { %v2677_v57 = vpop.f32.mrf.mxu0  ;;  %2682 = vmatmul.mubr.msk.bf16.vlgmr.msra.gmra.mxu0 %vm81_vm0, %v959_v15  ;;  %2703 = vmatprep.mubr.msk.bf16.mxu1 %vm81_vm0, %v959_v15  ;;  %v947_v45 = vld [vmem:[#allocation2 + $0x40] sm:$0xff] }
 0x4aa   :  { %933 = vst.msk [vmem:[#allocation2 + $0x60] sm:$0xff] %vm81_vm0, %v917_v30  ;;  %v920_v62 = vmax.f32 %v904_v23, 0.0  ;;  %v902_v21 = vadd.f32 %v3838_v7, %v879_v55  ;;  %v884_v26 = vmul.f32 %v2677_v57, %v3754_v63  ;;  %2716 = vmatpush3.bf16.msra.mxu0 %v3084_v20 }
 0x4ab   :  { %v855_v22 = vpop.f32.mrf.mxu0  ;;  %v950_v2 = vld [vmem:[#allocation2 + $0x58] sm:$0xff]  ;;  %2753 = vmatprep.subr.bf16.mxu0 %v3904_v61 }
 0x4ac   :  { %936 = vst.msk [vmem:[#allocation2 + $0x78] sm:$0xff] %vm81_vm0, %v920_v62  ;;  %v918_v28 = vmax.f32 %v902_v21, 0.0  ;;  %v907_v31 = vadd.f32 %v3838_v7, %v884_v26  ;;  %v882_v5 = vmul.f32 %v855_v22, %v3766_v9  ;;  %v961_v19 = vpack.c.bf16 %v950_v2, %v949_v51  ;;  %v3918_v21 = vld [vmem:[%s4570_s7] ss:$0 sm:$0xff] }
 0x4ad   :  { %v2678_v59 = vpop.f32.mrf.mxu0  ;;  %v948_v13 = vld [vmem:[#allocation2 + $0x48] sm:$0xff] }
 0x4ae   :  { %934 = vst.msk [vmem:[#allocation2 + $0x68] sm:$0xff] %vm81_vm0, %v918_v28  ;;  %v923_v8 = vmax.f32 %v907_v31, 0.0  ;;  %v905_v33 = vadd.f32 %v3838_v7, %v882_v5  ;;  %v885_v63 = vmul.f32 %v2678_v59, %v3758_v46  ;;  %v960_v49 = vpack.c.bf16 %v948_v13, %v947_v45 }
 0x4af   :  { %v858_v56 = vpop.f32.mrf.mxu0  ;;  %v953_v32 = vld [vmem:[#allocation2 + $0x70] sm:$0xff] }
 0x4b0   :  { %939 = vst.msk [vmem:[#allocation2 + $0x90] sm:$0xff] %vm81_vm0, %v923_v8  ;;  %v921_v48 = vmax.f32 %v905_v33, 0.0  ;;  %v908_v9 = vadd.f32 %v3838_v7, %v885_v63  ;;  %v883_v27 = vmul.f32 %v858_v56, %v3768_v34  ;;  %2685 = vmatprep.mubr.msk.bf16.mxu0 %vm81_vm0, %v960_v49  ;;  %2704 = vmatmul.mubr.msk.bf16.gmra.mxu1 %vm81_vm0, %v960_v49 }
 0x4b1   :  { %2686 = vmatmul.mubr.msk.bf16.gmra.mxu0 %vm81_vm0, %v961_v19  ;;  %2707 = vmatprep.mubr.msk.bf16.mxu1 %vm81_vm0, %v961_v19  ;;  %v951_v12 = vld [vmem:[#allocation2 + $0x60] sm:$0xff] }
 0x4b2   :  { %937 = vst.msk [vmem:[#allocation2 + $0x80] sm:$0xff] %vm81_vm0, %v921_v48  ;;  %v924_v46 = vmax.f32 %v908_v9, 0.0  ;;  %v906_v16 = vadd.f32 %v3838_v7, %v883_v27 }
 0x4b3   :  { %v954_v1 = vld [vmem:[#allocation2 + $0x78] sm:$0xff] }
 0x4b4   :  { %940 = vst.msk [vmem:[#allocation2 + $0x98] sm:$0xff] %vm81_vm0, %v924_v46  ;;  %v922_v54 = vmax.f32 %v906_v16, 0.0  ;;  %v963_v35 = vpack.c.bf16 %v954_v1, %v953_v32 }
 0x4b5   :  { %v952_v25 = vld [vmem:[#allocation2 + $0x68] sm:$0xff] }
 0x4b6   :  { %938 = vst.msk [vmem:[#allocation2 + $0x88] sm:$0xff] %vm81_vm0, %v922_v54  ;;  %v962_v34 = vpack.c.bf16 %v952_v25, %v951_v12  ;;  %v3085_v25 = vld [vmem:[%s4563_s0 + $0x8] sm:$0xff] }
 0x4b7   :  { %v967_v36 = vld [vmem:[#allocation2 + $0x90] sm:$0xff] }
 0x4b8   :  { %2689 = vmatprep.mubr.msk.bf16.mxu0 %vm81_vm0, %v962_v34  ;;  %2708 = vmatmul.mubr.msk.bf16.gmra.mxu1 %vm81_vm0, %v962_v34 }
 0x4b9   :  { %2690 = vmatmul.mubr.msk.bf16.gmra.mxu0 %vm81_vm0, %v963_v35  ;;  %2711 = vmatprep.mubr.msk.bf16.mxu1 %vm81_vm0, %v963_v35  ;;  %v955_v44 = vld [vmem:[#allocation2 + $0x80] sm:$0xff] }
 0x4bb   :  { %v968_v7 = vld [vmem:[#allocation2 + $0x98] sm:$0xff] }
 0x4bc   :  { %v969_v14 = vpack.c.bf16 %v968_v7, %v967_v36  ;;  %v3086_v36 = vld [vmem:[%s4563_s0] sm:$0xff] }
 0x4bd   :  { %v956_v42 = vld [vmem:[#allocation2 + $0x88] sm:$0xff] }
 0x4be   :  { %v964_v24 = vpack.c.bf16 %v956_v42, %v955_v44 }
 0x4c0   :  { %2693 = vmatprep.mubr.msk.bf16.mxu0 %vm81_vm0, %v964_v24  ;;  %2712 = vmatmul.mubr.msk.bf16.gmra.mxu1 %vm81_vm0, %v964_v24 }
 0x4c1   :  { %2694 = vmatmul.mubr.msk.bf16.gmra.mxu0 %vm81_vm0, %v969_v14 }
 0x4c2   :  { %2717 = vmatprep.mubr.msk.bf16.mxu0 %vm3211_vm1, %v3210_v0 }
 0x568   :  { %v2701_v47 = vpop.f32.mrf.mxu1 }
 0x569   :  { %v2683_v60 = vpop.f32.mrf.mxu0 }
 0x56a   :  { %v1143_v11 = vpop.f32.mrf.mxu1  ;;  %v1152_v51 = vadd.f32 %v2701_v47, %v2683_v60  ;;  %v3087_v60 = vld [vmem:[%s4563_s0 + $0x70] sm:$0xff] }
 0x56b   :  { %v1037_v53 = vpop.f32.mrf.mxu0 }
 0x56c   :  { %v2702_v29 = vpop.f32.mrf.mxu1  ;;  %v1144_v57 = vadd.f32 %v1143_v11, %v1037_v53  ;;  %v1215_v7 = vadd.f32 %v3918_v21, %v1152_v51  ;;  %v3088_v53 = vld [vmem:[%s4563_s0 + $0x78] sm:$0xff]  ;;  %v3096_v51 = vld [vmem:[%s4563_s0 + $0x50] sm:$0xff] }
 0x56d   :  { %v2684_v40 = vpop.f32.mrf.mxu0 }
 0x56e   :  { %v1146_v3 = vpop.f32.mrf.mxu1  ;;  %v1213_v5 = vadd.f32 %v3918_v21, %v1144_v57  ;;  %v1155_v13 = vadd.f32 %v2702_v29, %v2684_v40 }
 0x56f   :  { %v1040_v50 = vpop.f32.mrf.mxu0 }
 0x570   :  { %v3907_v38 = vpop.f32.mrf.mxu1  ;;  %v1147_v30 = vadd.f32 %v1146_v3, %v1040_v50  ;;  %v1229_v9 = vmax.f32 %v1213_v5, 0.0  ;;  %v1216_v54 = vadd.f32 %v3918_v21, %v1155_v13  ;;  %v3093_v5 = vld [vmem:[%s4563_s0 + $0x10] sm:$0xff]  ;;  %v3095_v13 = vld [vmem:[%s4563_s0 + $0x20] sm:$0xff] }
 0x571   :  { %v3909_v17 = vpop.f32.mrf.mxu0 }
 0x572   :  { %v1159_v0 = vpop.f32.mrf.mxu1  ;;  %v1214_v20 = vadd.f32 %v3918_v21, %v1147_v30  ;;  %v1245_v14 = vadd.f32 %v3086_v36, %v1229_v9  ;;  %v1232_v40 = vmax.f32 %v1216_v54, 0.0  ;;  %v3090_v30 = vld [vmem:[%s4563_s0 + $0x68] sm:$0xff] }
 0x573   :  { %v1053_v18 = vpop.f32.mrf.mxu0 }
 0x574   :  { %v2706_v58 = vpop.f32.mrf.mxu1  ;;  %v1230_v33 = vmax.f32 %v1214_v20, 0.0  ;;  %v1160_v1 = vadd.f32 %v1159_v0, %v1053_v18 }
 0x575   :  { %v2688_v37 = vpop.f32.mrf.mxu0 }
 0x576   :  { %v1162_v43 = vpop.f32.mrf.mxu1  ;;  %v1246_v34 = vadd.f32 %v3085_v25, %v1230_v33  ;;  %v1217_v3 = vadd.f32 %v3918_v21, %v1160_v1  ;;  %v1171_v18 = vadd.f32 %v2706_v58, %v2688_v37  ;;  %v1168_v58 = vadd.f32 %v3907_v38, %v3909_v17  ;;  %v3091_v38 = vld [vmem:[%s4563_s0 + $0x18] sm:$0xff] }
 0x577   :  { %v1056_v39 = vpop.f32.mrf.mxu0  ;;  %v1248_v17 = vadd.f32 %v3091_v38, %v1232_v40  ;;  %v4050_v38 = vld [vmem:[%s4564_s1 + $0x70] sm:$0xff] }
 0x578   :  { %v2709_v52 = vpop.f32.mrf.mxu1  ;;  %v1163_v56 = vadd.f32 %v1162_v43, %v1056_v39  ;;  %v3949_v0 = vpack.c.bf16 %v1246_v34, %v1245_v14  ;;  %v3099_v34 = vld [vmem:[%s4563_s0 + $0x30] sm:$0xff] }
 0x579   :  { %v2691_v10 = vpop.f32.mrf.mxu0 }
 0x57a   :  { %v3911_v4 = vpop.f32.mrf.mxu1  ;;  %v1184_v32 = vadd.f32 %v2709_v52, %v2691_v10  ;;  %v1218_v44 = vadd.f32 %v3918_v21, %v1163_v56 }
 0x57b   :  { %v3913_v6 = vpop.f32.mrf.mxu0 }
 0x57c   :  { %v2710_v41 = vpop.f32.mrf.mxu1  ;;  %v1223_v43 = vadd.f32 %v3918_v21, %v1184_v32  ;;  %v1234_v52 = vmax.f32 %v1218_v44, 0.0 }
 0x57d   :  { %v2692_v15 = vpop.f32.mrf.mxu0 }
 0x57e   :  { %v1178_v23 = vpop.f32.mrf.mxu1  ;;  %v1187_v27 = vadd.f32 %v2710_v41, %v2692_v15  ;;  %v3089_v41 = vld [vmem:[%s4563_s0 + $0x60] sm:$0xff] }
 0x57f   :  { %v1072_v55 = vpop.f32.mrf.mxu0 }
 0x580   :  { %v2713_v62 = vpop.f32.mrf.mxu1  ;;  %v1224_v47 = vadd.f32 %v3918_v21, %v1187_v27  ;;  %v1179_v10 = vadd.f32 %v1178_v23, %v1072_v55  ;;  %v1233_v55 = vmax.f32 %v1217_v3, 0.0 }
 0x581   :  { %v2695_v26 = vpop.f32.mrf.mxu0 }
 0x582   :  { %v1200_v22 = vadd.f32 %v2713_v62, %v2695_v26  ;;  %v1191_v28 = vpop.f32.mrf.mxu1  ;;  %v1231_v62 = vmax.f32 %v1215_v7, 0.0  ;;  %v1240_v37 = vmax.f32 %v1224_v47, 0.0  ;;  %v1176_v26 = vadd.f32 %v3911_v4, %v3913_v6  ;;  %v3100_v7 = vld [vmem:[%s4563_s0 + $0x40] sm:$0xff] }
 0x583   :  { %v1085_v31 = vpop.f32.mrf.mxu0  ;;  %v1222_v6 = vadd.f32 %v3918_v21, %v1179_v10 }
 0x584   :  { %v1227_v2 = vadd.f32 %v3918_v21, %v1200_v22  ;;  %v1192_v59 = vadd.f32 %v1191_v28, %v1085_v31  ;;  %v2714_v45 = vpop.f32.mrf.mxu1  ;;  %v1220_v22 = vadd.f32 %v3918_v21, %v1171_v18  ;;  %v1239_v28 = vmax.f32 %v1223_v43, 0.0  ;;  %v3092_v31 = vld [vmem:[%s4563_s0 + $0x28] sm:$0xff] }
 0x585   :  { %v2696_v8 = vpop.f32.mrf.mxu0  ;;  %v1250_v4 = vadd.f32 %v3092_v31, %v1234_v52  ;;  %v1221_v33 = vadd.f32 %v3918_v21, %v1176_v26 }
 0x586   :  { %v1203_v63 = vadd.f32 %v2714_v45, %v2696_v8  ;;  %v1194_v49 = vpop.f32.mrf.mxu1  ;;  %v1225_v19 = vadd.f32 %v3918_v21, %v1192_v59  ;;  %v3924_v46 = vmax.f32 %v1227_v2, 0.0  ;;  %v1247_v2 = vadd.f32 %v3093_v5, %v1231_v62  ;;  %v4059_v5 = vld [vmem:[%s4564_s1 + $0x60] sm:$0xff] }
 0x587   :  { %v1088_v48 = vpop.f32.mrf.mxu0  ;;  %v1219_v59 = vadd.f32 %v3918_v21, %v1168_v58  ;;  %v1249_v8 = vadd.f32 %v3095_v13, %v1233_v55  ;;  %v1255_v56 = vadd.f32 %v3096_v51, %v1239_v28  ;;  %v1237_v54 = vmax.f32 %v1221_v33, 0.0 }
 0x588   :  { %v1228_v16 = vadd.f32 %v3918_v21, %v1203_v63  ;;  %v1195_v12 = vadd.f32 %v1194_v49, %v1088_v48  ;;  %v1241_v42 = vmax.f32 %v1225_v19, 0.0  ;;  %v1259_v11 = vadd.f32 %v3087_v60, %v3924_v46 }
 0x589   :  { %v1262_v63 = vpack.c.bf16 %v1248_v17, %v1247_v2  ;;  %v1236_v49 = vmax.f32 %v1220_v22, 0.0  ;;  %v1263_v19 = vpack.c.bf16 %v1250_v4, %v1249_v8  ;;  %v1238_v48 = vmax.f32 %v1222_v6, 0.0  ;;  %v4074_v8 = vld [vmem:[%s4564_s1 + $0x50] sm:$0xff] }
 0x58a   :  { %v3931_v35 = vmax.f32 %v1228_v16, 0.0  ;;  %v1226_v24 = vadd.f32 %v3918_v21, %v1195_v12  ;;  %v1257_v15 = vadd.f32 %v3089_v41, %v1241_v42  ;;  %v1235_v9 = vmax.f32 %v1219_v59, 0.0  ;;  %v3097_v21 = vld [vmem:[%s4563_s0 + $0x38] sm:$0xff]  ;;  %v3098_v12 = vld [vmem:[%s4563_s0 + $0x48] sm:$0xff] }
 0x58b   :  { %v1252_v1 = vadd.f32 %v3097_v21, %v1236_v49  ;;  %v1254_v25 = vadd.f32 %v3098_v12, %v1238_v48  ;;  %v1253_v44 = vadd.f32 %v3100_v7, %v1237_v54  ;;  %v1324_v60 = vsel %vm81_vm0, %v1263_v19, 0  ;;  %v4067_v59 = vld [vmem:[%s4564_s1 + $0x78] sm:$0xff]  ;;  %v4104_v21 = vld [vmem:[%s4564_s1 + $0x30] sm:$0xff]  ;;  %v4112_v12 = vld [vmem:[%s4564_s1 + $0x48] sm:$0xff] }
 0x58c   :  { %v1260_v29 = vadd.f32 %v3088_v53, %v3931_v35  ;;  %v1242_v50 = vmax.f32 %v1226_v24, 0.0  ;;  %v1251_v32 = vadd.f32 %v3099_v34, %v1235_v9  ;;  %v1318_v53 = vsel %vm81_vm0, %v3949_v0, 0  ;;  %v4097_v9 = vld [vmem:[%s4564_s1 + $0x58] sm:$0xff]  ;;  %v4123_v7 = vld [vmem:[%s4564_s1 + $0x20] sm:$0xff] }
 0x58d   :  { %v1265_v24 = vpack.c.bf16 %v1254_v25, %v1253_v44 }
 0x58e   :  { %v3952_v39 = vpack.c.bf16 %v1260_v29, %v1259_v11  ;;  %v1258_v57 = vadd.f32 %v3090_v30, %v1242_v50  ;;  %v1264_v42 = vpack.c.bf16 %v1252_v1, %v1251_v32  ;;  %v1321_v11 = vsel %vm81_vm0, %v1262_v63, 0 }
 0x58f   :  { %v1330_v14 = vsel %vm81_vm0, %v1265_v24, 0 }
 0x590   :  { %2718 = vmatmul.mubr.msk.bf16.vlgmr.msra.gmra.mxu0 %vm81_vm0, %v3952_v39  ;;  %2847 = vmatprep.subr.msk.bf16.mxu1 %vm81_vm0, %v3952_v39  ;;  %v1270_v23 = vsel %vm81_vm0, %v3952_v39, 0  ;;  %v1267_v20 = vpack.c.bf16 %v1258_v57, %v1257_v15  ;;  %v1327_v47 = vsel %vm81_vm0, %v1264_v42, 0 }
 0x591   :  { %2722 = vmatpush3.bf16.xpose.msra.mxu1 %v1270_v23  ;;  %2755 = vmatprep.mubr.msk.bf16.mxu0 %vm81_vm0, %v3949_v0 }
 0x592   :  { %2754 = vmatpush3.bf16.msra.mxu0 %v3904_v61  ;;  %2848 = vmatprep.subr.msk.bf16.mxu1 %vm81_vm0, %v1267_v20  ;;  %v3094_v61 = vld [vmem:[%s4563_s0 + $0x58] sm:$0xff]  ;;  %v1336_v16 = vsel %vm81_vm0, %v1267_v20, 0 }
 0x593   :  { %v1256_v45 = vadd.f32 %v3094_v61, %v1240_v37 }
 0x595   :  { %v1266_v27 = vpack.c.bf16 %v1256_v45, %v1255_v56 }
 0x597   :  { %v1333_v36 = vsel %vm81_vm0, %v1266_v27, 0 }
 0x598   :  { %2756 = vmatmul.mubr.msk.bf16.vlgmr.msra.gmra.mxu0 %vm81_vm0, %v1262_v63 }
 0x599   :  { %2724 = vmatpush3.bf16.xpose.msra.mxu1 %v1336_v16  ;;  %2759 = vmatprep.mubr.msk.bf16.mxu0 %vm81_vm0, %v1263_v19 }
 0x59a   :  { %2849 = vmatprep.subr.msk.bf16.mxu1 %vm81_vm0, %v1266_v27 }
 0x5a0   :  { %2760 = vmatmul.mubr.msk.bf16.gmra.mxu0 %vm81_vm0, %v1264_v42 }
 0x5a1   :  { %2726 = vmatpush3.bf16.xpose.msra.mxu1 %v1333_v36  ;;  %2763 = vmatprep.mubr.msk.bf16.mxu0 %vm81_vm0, %v1265_v24 }
 0x5a2   :  { %2850 = vmatprep.subr.msk.bf16.mxu1 %vm81_vm0, %v1265_v24 }
 0x5a8   :  { %2764 = vmatmul.mubr.msk.bf16.gmra.mxu0 %vm81_vm0, %v1266_v27 }
 0x5a9   :  { %2728 = vmatpush3.bf16.xpose.msra.mxu1 %v1330_v14  ;;  %2767 = vmatprep.mubr.msk.bf16.mxu0 %vm81_vm0, %v1267_v20 }
 0x5aa   :  { %2851 = vmatprep.subr.msk.bf16.mxu1 %vm81_vm0, %v1264_v42  ;;  %v4131_v42 = vld [vmem:[%s4564_s1 + $0x38] sm:$0xff] }
 0x5b0   :  { %2768 = vmatmul.mubr.msk.bf16.gmra.mxu0 %vm81_vm0, %v3952_v39 }
 0x5b1   :  { %2730 = vmatpush3.bf16.xpose.msra.mxu1 %v1327_v47  ;;  %v4143_v47 = vld [vmem:[%s4564_s1 + $0x10] sm:$0xff] }
 0x5b2   :  { %2852 = vmatprep.subr.msk.bf16.mxu1 %vm81_vm0, %v1263_v19  ;;  %v4089_v19 = vld [vmem:[%s4564_s1 + $0x40] sm:$0xff] }
 0x5b9   :  { %2732 = vmatpush3.bf16.xpose.msra.mxu1 %v1324_v60 }
 0x5ba   :  { %2853 = vmatprep.subr.msk.bf16.mxu1 %vm81_vm0, %v1262_v63  ;;  %v4082_v63 = vld [vmem:[%s4564_s1 + $0x68] sm:$0xff] }
 0x5c1   :  { %2734 = vmatpush3.bf16.xpose.msra.mxu1 %v1321_v11  ;;  %v4151_v11 = vld [vmem:[%s4564_s1 + $0x28] sm:$0xff] }
 0x5c2   :  { %2854 = vmatprep.subr.msk.bf16.mxu1 %vm81_vm0, %v3949_v0 }
 0x5c9   :  { %2736 = vmatpush3.bf16.xpose.msra.mxu1 %v1318_v53 }
 0x650   :  { %v1306_v29 = vpop.f32.mrf.mxu0 }
 0x652   :  { %v2719_v40 = vpop.f32.mrf.mxu0 }
 0x653   :  { %v4162_v40 = vld [vmem:[%s4564_s1] sm:$0xff] }
 0x654   :  { %v1309_v3 = vpop.f32.mrf.mxu0 }
 0x655   :  { %v1313_v50 = vpack.c.bf16 %v1309_v3, %v1306_v29 }
 0x656   :  { %v2720_v18 = vpop.f32.mrf.mxu0 }
 0x657   :  { %2737 = vmatprep.mubr.msk.bf16.mxu1 %vm81_vm0, %v1313_v50 }
 0x658   :  { %2738 = vmatmul.mubr.msk.bf16.vlgmr.msra.gmra.mxu1 %vm81_vm0, %v1313_v50 }
 0x659   :  { %2741 = vmatprep.mubr.msk.bf16.mxu1 %vm81_vm0, %v1313_v50 }
 0x660   :  { %2742 = vmatmul.mubr.msk.bf16.gmra.mxu1 %vm81_vm0, %v1313_v50 }
 0x661   :  { %2745 = vmatprep.mubr.msk.bf16.mxu1 %vm81_vm0, %v1313_v50 }
 0x668   :  { %2746 = vmatmul.mubr.msk.bf16.gmra.mxu1 %vm81_vm0, %v1313_v50 }
 0x669   :  { %2749 = vmatprep.mubr.msk.bf16.mxu1 %vm81_vm0, %v1313_v50 }
 0x670   :  { %2750 = vmatmul.mubr.msk.bf16.gmra.mxu1 %vm81_vm0, %v1313_v50  ;;  %v4170_v50 = vld [vmem:[%s4564_s1 + $0x18] sm:$0xff] }
 0x718   :  { %v4039_v0 = vpop.f32.mrf.mxu1 }
 0x719   :  { %v1437_v34 = vmax.f32 %v4039_v0, 0.0  ;;  %v4180_v0 = vld [vmem:[%s4564_s1 + $0x8] sm:$0xff] }
 0x71a   :  { %v4041_v43 = vpop.f32.mrf.mxu1 }
 0x71b   :  { %v1435_v36 = vmax.f32 %v4041_v43, 0.0  ;;  %v4146_v60 = vmul.f32 %v4143_v47, %v1437_v34 }
 0x71c   :  { %v4043_v39 = vpop.f32.mrf.mxu1 }
 0x71d   :  { %v1438_v14 = vmax.f32 %v4043_v39, 0.0  ;;  %v4165_v3 = vmul.f32 %v4162_v40, %v1435_v36 }
 0x71e   :  { %v4045_v52 = vpop.f32.mrf.mxu1 }
 0x71f   :  { %v1436_v29 = vmax.f32 %v4045_v52, 0.0  ;;  %v4173_v18 = vmul.f32 %v4170_v50, %v1438_v14 }
 0x720   :  { %v2743_v10 = vpop.f32.mrf.mxu1 }
 0x721   :  { %v1441_v51 = vmax.f32 %v2743_v10, 0.0  ;;  %v4183_v43 = vmul.f32 %v4180_v0, %v1436_v29 }
 0x722   :  { %v1388_v41 = vpop.f32.mrf.mxu1 }
 0x723   :  { %v1439_v16 = vmax.f32 %v1388_v41, 0.0  ;;  %v4107_v1 = vmul.f32 %v4104_v21, %v1441_v51 }
 0x724   :  { %v2744_v15 = vpop.f32.mrf.mxu1 }
 0x725   :  { %v1442_v54 = vmax.f32 %v2744_v15, 0.0  ;;  %v4126_v44 = vmul.f32 %v4123_v7, %v1439_v16 }
 0x726   :  { %v1391_v30 = vpop.f32.mrf.mxu1 }
 0x727   :  { %v1440_v32 = vmax.f32 %v1391_v30, 0.0  ;;  %v4134_v24 = vmul.f32 %v4131_v42, %v1442_v54 }
 0x728   :  { %v2747_v57 = vpop.f32.mrf.mxu1 }
 0x729   :  { %v1445_v4 = vmax.f32 %v2747_v57, 0.0  ;;  %v4154_v53 = vmul.f32 %v4151_v11, %v1440_v32 }
 0x72a   :  { %v1404_v62 = vpop.f32.mrf.mxu1 }
 0x72b   :  { %v1443_v45 = vmax.f32 %v1404_v62, 0.0  ;;  %v4077_v33 = vmul.f32 %v4074_v8, %v1445_v4 }
 0x72c   :  { %v2748_v58 = vpop.f32.mrf.mxu1 }
 0x72d   :  { %v1446_v13 = vmax.f32 %v2748_v58, 0.0  ;;  %v4092_v48 = vmul.f32 %v4089_v19, %v1443_v45 }
 0x72e   :  { %v1407_v37 = vpop.f32.mrf.mxu1 }
 0x72f   :  { %v1444_v56 = vmax.f32 %v1407_v37, 0.0  ;;  %v1462_v27 = vmul.f32 %v4097_v9, %v1446_v13 }
 0x730   :  { %v2751_v23 = vpop.f32.mrf.mxu1 }
 0x731   :  { %v1449_v55 = vmax.f32 %v2751_v23, 0.0  ;;  %v4115_v25 = vmul.f32 %v4112_v12, %v1444_v56 }
 0x732   :  { %v1420_v26 = vpop.f32.mrf.mxu1 }
 0x733   :  { %v1447_v20 = vmax.f32 %v1420_v26, 0.0  ;;  %v4053_v17 = vmul.f32 %v4050_v38, %v1449_v55 }
 0x734   :  { %v2752_v22 = vpop.f32.mrf.mxu1 }
 0x735   :  { %v1450_v28 = vmax.f32 %v2752_v22, 0.0  ;;  %1495 = vmax.xlane.f32.xlu0 %v4053_v17  ;;  %v4062_v2 = vmul.f32 %v4059_v5, %v1447_v20 }
 0x736   :  { %v1423_v31 = vpop.f32.mrf.mxu1 }
 0x737   :  { %v1448_v6 = vmax.f32 %v1423_v31, 0.0  ;;  %v1466_v61 = vmul.f32 %v4067_v59, %v1450_v28 }
 0x739   :  { %1491 = vmax.xlane.f32.xlu0 %v4062_v2  ;;  %1497 = vmax.xlane.f32.xlu1 %v1466_v61  ;;  %v1464_v49 = vmul.f32 %v4082_v63, %v1448_v6 }
 0x73d   :  { %1487 = vmax.xlane.f32.xlu0 %v4077_v33  ;;  %1493 = vmax.xlane.f32.xlu1 %v1464_v49 }
 0x741   :  { %1483 = vmax.xlane.f32.xlu0 %v4092_v48  ;;  %1489 = vmax.xlane.f32.xlu1 %v1462_v27 }
 0x745   :  { %1479 = vmax.xlane.f32.xlu0 %v4107_v1  ;;  %1485 = vmax.xlane.f32.xlu1 %v4115_v25 }
 0x749   :  { %1475 = vmax.xlane.f32.xlu0 %v4126_v44  ;;  %1481 = vmax.xlane.f32.xlu1 %v4134_v24 }
 0x74d   :  { %1471 = vmax.xlane.f32.xlu0 %v4146_v60  ;;  %1477 = vmax.xlane.f32.xlu1 %v4154_v53 }
 0x751   :  { %1467 = vmax.xlane.f32.xlu0 %v4165_v3  ;;  %1473 = vmax.xlane.f32.xlu1 %v4173_v18 }
 0x755   :  { %1469 = vmax.xlane.f32.xlu1 %v4183_v43 }
 0x7be   :  { %v1496_v39 = vpop.xlane.xlu0 %1495 }
 0x7bf   :  { %v1513_v52 = vsub.f32 %v4053_v17, %v1496_v39 }
 0x7c1   :  { %v1543_v10 = vmul.f32 1.442695, %v1513_v52 }
 0x7c2   :  { %v1492_v41 = vpop.xlane.xlu0 %1491  ;;  %v1498_v15 = vpop.xlane.xlu1 %1497 }
 0x7c3   :  { %2968 = vpow2.f32 %v1543_v10  ;;  %v1511_v30 = vsub.f32 %v4062_v2, %v1492_v41  ;;  %v1514_v57 = vsub.f32 %v1466_v61, %v1498_v15 }
 0x7c5   :  { %v1539_v62 = vmul.f32 1.442695, %v1511_v30  ;;  %v1545_v58 = vmul.f32 1.442695, %v1514_v57 }
 0x7c6   :  { %v1488_v37 = vpop.xlane.xlu0 %1487  ;;  %v1494_v23 = vpop.xlane.xlu1 %1493 }
 0x7c7   :  { %2970 = vpow2.f32 %v1539_v62  ;;  %v1509_v55 = vsub.f32 %v4077_v33, %v1488_v37  ;;  %v1512_v26 = vsub.f32 %v1464_v49, %v1494_v23 }
 0x7c8   :  { %2972 = vpow2.f32 %v1545_v58 }
 0x7c9   :  { %v1535_v20 = vmul.f32 1.442695, %v1509_v55  ;;  %v1541_v22 = vmul.f32 1.442695, %v1512_v26 }
 0x7ca   :  { %v1484_v28 = vpop.xlane.xlu0 %1483  ;;  %v1490_v17 = vpop.xlane.xlu1 %1489 }
 0x7cb   :  { %2974 = vpow2.f32 %v1535_v20  ;;  %v1507_v31 = vsub.f32 %v4092_v48, %v1484_v28  ;;  %v1510_v4 = vsub.f32 %v1462_v27, %v1490_v17 }
 0x7cc   :  { %2976 = vpow2.f32 %v1541_v22 }
 0x7cd   :  { %v1531_v6 = vmul.f32 1.442695, %v1507_v31  ;;  %v1537_v2 = vmul.f32 1.442695, %v1510_v4 }
 0x7ce   :  { %v1480_v61 = vpop.xlane.xlu0 %1479  ;;  %v1486_v45 = vpop.xlane.xlu1 %1485 }
 0x7cf   :  { %2978 = vpow2.f32 %v1531_v6  ;;  %v1505_v13 = vsub.f32 %v4107_v1, %v1480_v61  ;;  %v1508_v33 = vsub.f32 %v4115_v25, %v1486_v45 }
 0x7d0   :  { %v2969_v49 = vpop.eup %2968  ;;  %2980 = vpow2.f32 %v1537_v2 }
 0x7d1   :  { %v1527_v51 = vmul.f32 1.442695, %v1505_v13  ;;  %v1533_v56 = vmul.f32 1.442695, %v1508_v33  ;;  %v4193_v16 = vmul.f32 %v4050_v38, %v2969_v49 }
 0x7d2   :  { %v1476_v54 = vpop.xlane.xlu0 %1475  ;;  %v1482_v48 = vpop.xlane.xlu1 %1481 }
 0x7d3   :  { %2982 = vpow2.f32 %v1527_v51  ;;  %v1503_v27 = vsub.f32 %v4126_v44, %v1476_v54  ;;  %v1506_v34 = vsub.f32 %v4134_v24, %v1482_v48  ;;  %1591 = vadd.xlane.f32.xlu0 %v4193_v16  ;;  %v4269_v54 = vld [vmem:[%s4571_s8] ss:$0 sm:$0xff] }
 0x7d4   :  { %v2971_v32 = vpop.eup %2970  ;;  %2984 = vpow2.f32 %v1533_v56 }
 0x7d5   :  { %v2973_v1 = vpop.eup %2972  ;;  %v1523_v25 = vmul.f32 1.442695, %v1503_v27  ;;  %v1529_v36 = vmul.f32 1.442695, %v1506_v34  ;;  %v4199_v14 = vmul.f32 %v4059_v5, %v2971_v32 }
 0x7d6   :  { %v1472_v29 = vpop.xlane.xlu0 %1471  ;;  %v1478_v38 = vpop.xlane.xlu1 %1477  ;;  %v4202_v39 = vmul.f32 %v4067_v59, %v2973_v1 }
 0x7d7   :  { %2986 = vpow2.f32 %v1523_v25  ;;  %v1501_v44 = vsub.f32 %v4146_v60, %v1472_v29  ;;  %v1504_v24 = vsub.f32 %v4154_v53, %v1478_v38  ;;  %1587 = vadd.xlane.f32.xlu0 %v4199_v14 }
 0x7d8   :  { %v2975_v52 = vpop.eup %2974  ;;  %2988 = vpow2.f32 %v1529_v36  ;;  %1593 = vadd.xlane.f32.xlu1 %v4202_v39  ;;  %v4283_v36 = vld [vmem:[%s4573_s10] ss:$0 sm:$0xff] }
 0x7d9   :  { %v2977_v10 = vpop.eup %2976  ;;  %v1519_v41 = vmul.f32 1.442695, %v1501_v44  ;;  %v1525_v5 = vmul.f32 1.442695, %v1504_v24  ;;  %v4209_v15 = vmul.f32 %v4074_v8, %v2975_v52 }
 0x7da   :  { %v1468_v30 = vpop.xlane.xlu0 %1467  ;;  %v1474_v59 = vpop.xlane.xlu1 %1473  ;;  %v4212_v57 = vmul.f32 %v4082_v63, %v2977_v10 }
 0x7db   :  { %2990 = vpow2.f32 %v1519_v41  ;;  %v1499_v60 = vsub.f32 %v4165_v3, %v1468_v30  ;;  %v1502_v53 = vsub.f32 %v4173_v18, %v1474_v59  ;;  %1583 = vadd.xlane.f32.xlu0 %v4209_v15  ;;  %v2296_v41 = vmul.f32 %v4269_v54, %v3931_v35 }
 0x7dc   :  { %v2979_v62 = vpop.eup %2978  ;;  %2992 = vpow2.f32 %v1525_v5  ;;  %1589 = vadd.xlane.f32.xlu1 %v4212_v57 }
 0x7dd   :  { %v2981_v58 = vpop.eup %2980  ;;  %v1515_v37 = vmul.f32 1.442695, %v1499_v60  ;;  %v1521_v8 = vmul.f32 1.442695, %v1502_v53  ;;  %v4219_v23 = vmul.f32 %v4089_v19, %v2979_v62  ;;  %v2304_v62 = vadd.f32 %v4283_v36, %v2296_v41 }
 0x7de   :  { %v1470_v55 = vpop.xlane.xlu1 %1469  ;;  %v4222_v63 = vmul.f32 %v4097_v9, %v2981_v58 }
 0x7df   :  { %2994 = vpow2.f32 %v1515_v37  ;;  %v1500_v3 = vsub.f32 %v4183_v43, %v1470_v55  ;;  %1579 = vadd.xlane.f32.xlu0 %v4219_v23 }
 0x7e0   :  { %v2983_v18 = vpop.eup %2982  ;;  %2996 = vpow2.f32 %v1521_v8  ;;  %1585 = vadd.xlane.f32.xlu1 %v4222_v63 }
 0x7e1   :  { %v2985_v26 = vpop.eup %2984  ;;  %v1517_v20 = vmul.f32 1.442695, %v1500_v3  ;;  %v4228_v22 = vmul.f32 %v4104_v21, %v2983_v18 }
 0x7e2   :  { %v4231_v19 = vmul.f32 %v4112_v12, %v2985_v26 }
 0x7e3   :  { %2998 = vpow2.f32 %v1517_v20  ;;  %1575 = vadd.xlane.f32.xlu0 %v4228_v22 }
 0x7e4   :  { %v2987_v9 = vpop.eup %2986  ;;  %1581 = vadd.xlane.f32.xlu1 %v4231_v19 }
 0x7e5   :  { %v2989_v43 = vpop.eup %2988  ;;  %v4236_v28 = vmul.f32 %v4123_v7, %v2987_v9 }
 0x7e6   :  { %v4239_v17 = vmul.f32 %v4131_v42, %v2989_v43 }
 0x7e7   :  { %1571 = vadd.xlane.f32.xlu0 %v4236_v28 }
 0x7e8   :  { %v2991_v21 = vpop.eup %2990  ;;  %1577 = vadd.xlane.f32.xlu1 %v4239_v17 }
 0x7e9   :  { %v2993_v12 = vpop.eup %2992  ;;  %v4244_v31 = vmul.f32 %v4143_v47, %v2991_v21 }
 0x7ea   :  { %v4247_v4 = vmul.f32 %v4151_v11, %v2993_v12 }
 0x7eb   :  { %1567 = vadd.xlane.f32.xlu0 %v4244_v31 }
 0x7ec   :  { %v2995_v6 = vpop.eup %2994  ;;  %1573 = vadd.xlane.f32.xlu1 %v4247_v4 }
 0x7ed   :  { %v2997_v7 = vpop.eup %2996  ;;  %v4252_v42 = vmul.f32 %v4162_v40, %v2995_v6 }
 0x7ee   :  { %v4255_v2 = vmul.f32 %v4170_v50, %v2997_v7 }
 0x7ef   :  { %1563 = vadd.xlane.f32.xlu0 %v4252_v42 }
 0x7f0   :  { %v2999_v61 = vpop.eup %2998  ;;  %1569 = vadd.xlane.f32.xlu1 %v4255_v2 }
 0x7f1   :  { %v4260_v47 = vmul.f32 %v4180_v0, %v2999_v61 }
 0x7f4   :  { %1565 = vadd.xlane.f32.xlu1 %v4260_v47 }
 0x85c   :  { %v1592_v11 = vpop.xlane.xlu0 %1591 }
 0x85d   :  { %3000 = vrcp.f32 %v1592_v11 }
 0x860   :  { %v1588_v45 = vpop.xlane.xlu0 %1587 }
 0x861   :  { %3002 = vrcp.f32 %v1588_v45  ;;  %v1594_v13 = vpop.xlane.xlu1 %1593 }
 0x862   :  { %3004 = vrcp.f32 %v1594_v13 }
 0x864   :  { %v1584_v40 = vpop.xlane.xlu0 %1583 }
 0x865   :  { %3006 = vrcp.f32 %v1584_v40  ;;  %v1590_v50 = vpop.xlane.xlu1 %1589 }
 0x866   :  { %3008 = vrcp.f32 %v1590_v50 }
 0x868   :  { %v1580_v33 = vpop.xlane.xlu0 %1579 }
 0x869   :  { %3010 = vrcp.f32 %v1580_v33  ;;  %v1586_v49 = vpop.xlane.xlu1 %1585 }
 0x86a   :  { %v3001_v51 = vpop.eup %3000  ;;  %3012 = vrcp.f32 %v1586_v49 }
 0x86b   :  { %v4264_v0 = vmul.f32 %v3001_v51, %v4193_v16  ;;  %v2295_v16 = vmul.f32 %v4269_v54, %v3924_v46 }
 0x86c   :  { %v1576_v56 = vpop.xlane.xlu0 %1575 }
 0x86d   :  { %3014 = vrcp.f32 %v1576_v56  ;;  %v1582_v48 = vpop.xlane.xlu1 %1581  ;;  %1655 = vadd.xlane.f32.xlu0 %v4264_v0  ;;  %v2303_v24 = vadd.f32 %v4283_v36, %v2295_v16  ;;  %v2871_v56 = vld [vmem:[#allocation8 + $0x10] sm:$0xff]  }
 0x86e   :  { %v3003_v27 = vpop.eup %3002  ;;  %3016 = vrcp.f32 %v1582_v48  ;;  %2821 = vmatprep.subr.bf16.mxu1 %v2871_v56  ;;  %v4360_v48 = vpop.f32.mrf.mxu0 }
 0x86f   :  { %v3005_v34 = vpop.eup %3004  ;;  %v4273_v32 = vmul.f32 %v3003_v27, %v4199_v14  ;;  %2822 = vmatpush3.bf16.msra.mxu1 %v2871_v56 }
 0x870   :  { %v1572_v1 = vpop.xlane.xlu0 %1571  ;;  %v4278_v25 = vmul.f32 %v3005_v34, %v4202_v39  ;;  %v4362_v27 = vpop.f32.mrf.mxu0 }
 0x871   :  { %3018 = vrcp.f32 %v1572_v1  ;;  %v1578_v29 = vpop.xlane.xlu1 %1577  ;;  %1651 = vadd.xlane.f32.xlu0 %v4273_v32 }
 0x872   :  { %v3007_v38 = vpop.eup %3006  ;;  %3020 = vrcp.f32 %v1578_v29  ;;  %1657 = vadd.xlane.f32.xlu1 %v4278_v25  ;;  %v4364_v34 = vpop.f32.mrf.mxu0 }
 0x873   :  { %v3009_v44 = vpop.eup %3008  ;;  %v4290_v39 = vmul.f32 %v3007_v38, %v4209_v15 }
 0x874   :  { %v1568_v52 = vpop.xlane.xlu0 %1567  ;;  %v4294_v10 = vmul.f32 %v3009_v44, %v4212_v57  ;;  %v4366_v16 = vpop.f32.mrf.mxu0 }
 0x875   :  { %3022 = vrcp.f32 %v1568_v52  ;;  %v1574_v5 = vpop.xlane.xlu1 %1573  ;;  %1647 = vadd.xlane.f32.xlu0 %v4290_v39 }
 0x876   :  { %v3011_v30 = vpop.eup %3010  ;;  %3024 = vrcp.f32 %v1574_v5  ;;  %1653 = vadd.xlane.f32.xlu1 %v4294_v10 }
 0x877   :  { %v3013_v59 = vpop.eup %3012  ;;  %v4303_v60 = vmul.f32 %v3011_v30, %v4219_v23  ;;  %3026 = vtanh.f32 %v2303_v24 }
 0x878   :  { %v1564_v57 = vpop.xlane.xlu0 %1563  ;;  %v4306_v53 = vmul.f32 %v3013_v59, %v4222_v63 }
 0x879   :  { %3028 = vrcp.f32 %v1564_v57  ;;  %v1570_v58 = vpop.xlane.xlu1 %1569  ;;  %1643 = vadd.xlane.f32.xlu0 %v4303_v60 }
 0x87a   :  { %v3015_v37 = vpop.eup %3014  ;;  %3030 = vrcp.f32 %v1570_v58  ;;  %1649 = vadd.xlane.f32.xlu1 %v4306_v53 }
 0x87b   :  { %v3017_v23 = vpop.eup %3016  ;;  %v4314_v55 = vmul.f32 %v3015_v37, %v4228_v22  ;;  %3032 = vtanh.f32 %v2304_v62 }
 0x87c   :  { %v4317_v63 = vmul.f32 %v3017_v23, %v4231_v19 }
 0x87d   :  { %v1566_v3 = vpop.xlane.xlu1 %1565  ;;  %1639 = vadd.xlane.f32.xlu0 %v4314_v55 }
 0x87e   :  { %v3019_v18 = vpop.eup %3018  ;;  %3034 = vrcp.f32 %v1566_v3  ;;  %1645 = vadd.xlane.f32.xlu1 %v4317_v63 }
 0x87f   :  { %v3021_v20 = vpop.eup %3020  ;;  %v4324_v9 = vmul.f32 %v3019_v18, %v4236_v28 }
 0x880   :  { %v4327_v22 = vmul.f32 %v3021_v20, %v4239_v17  ;;  %v4343_v17 = vld [vmem:[%s4572_s9] ss:$0 sm:$0xff] }
 0x881   :  { %1635 = vadd.xlane.f32.xlu0 %v4324_v9 }
 0x882   :  { %v3023_v19 = vpop.eup %3022  ;;  %1641 = vadd.xlane.f32.xlu1 %v4327_v22  ;;  %v1832_v43 = vpack.c.bf16 %v4327_v22, %v4314_v55  ;;  %v2032_v22 = vld [vmem:[#allocation2 + $0x10] sm:$0xff] }
 0x883   :  { %v3025_v21 = vpop.eup %3024  ;;  %v4334_v12 = vmul.f32 %v3023_v19, %v4244_v31 }
 0x884   :  { %v4337_v6 = vmul.f32 %v3025_v21, %v4247_v4  ;;  %v3027_v28 = vpop.eup %3026 }
 0x885   :  { %1631 = vadd.xlane.f32.xlu0 %v4334_v12  ;;  %v2313_v45 = vmul.f32 %v3027_v28, %v4343_v17 }
 0x886   :  { %v3029_v7 = vpop.eup %3028  ;;  %1637 = vadd.xlane.f32.xlu1 %v4337_v6  ;;  %v1831_v61 = vpack.c.bf16 %v4337_v6, %v4324_v9  ;;  %v4578_v9 = vpack.c.bf16 %v4278_v25, %v4264_v0  ;;  %v2030_v6 = vld [vmem:[#allocation2] sm:$0xff] }
 0x887   :  { %v3031_v11 = vpop.eup %3030  ;;  %v1596_v31 = vmul.f32 %v3029_v7, %v4252_v42  ;;  %v2315_v33 = vsel %vm81_vm0, %v2313_v45, 0.0 }
 0x888   :  { %v4350_v4 = vmul.f32 %v3031_v11, %v4255_v2  ;;  %v3033_v13 = vpop.eup %3032 }
 0x889   :  { %1627 = vadd.xlane.f32.xlu0 %v1596_v31  ;;  %v2314_v42 = vmul.f32 %v3033_v13, %v4343_v17 }
 0x88a   :  { %1633 = vadd.xlane.f32.xlu1 %v4350_v4  ;;  %v1830_v40 = vpack.c.bf16 %v4350_v4, %v4334_v12  ;;  %v4577_v12 = vpack.c.bf16 %v4294_v10, %v4273_v32  ;;  %v4482_v32 = vld [vmem:[%s4568_s5 + $0x1] ss:$0 sm:$0xff] }
 0x88b   :  { %v3035_v50 = vpop.eup %3034  ;;  %v2318_v51 = vsel %vm81_vm0, %v2314_v42, 0.0 }
 0x88c   :  { %v1598_v49 = vmul.f32 %v3035_v50, %v4260_v47  ;;  %v4368_v47 = vpop.f32.mrf.mxu0 }
 0x88d   :  { %2316 = vadd.xlane.f32.xlu0 %v2315_v33 }
 0x88e   :  { %1629 = vadd.xlane.f32.xlu1 %v1598_v49  ;;  %v1829_v2 = vpack.c.bf16 %v1598_v49, %v1596_v31  ;;  %v4370_v1 = vpop.f32.mrf.mxu0 }
 0x890   :  { %2787 = vmatprep.mubr.bf16.mxu0 %v1829_v2  ;;  %v4372_v29 = vpop.f32.mrf.mxu0 }
 0x892   :  { %2319 = vadd.xlane.f32.xlu1 %v2318_v51  ;;  %v4374_v38 = vpop.f32.mrf.mxu0 }
 0x894   :  { %v4376_v44 = vpop.f32.mrf.mxu0 }
 0x896   :  { %v4378_v41 = vpop.f32.mrf.mxu0 }
 0x898   :  { %v4380_v57 = vpop.f32.mrf.mxu0 }
 0x89a   :  { %v4382_v3 = vpop.f32.mrf.mxu0 }
 0x89c   :  { %v2769_v28 = vpop.f32.mrf.mxu0 }
 0x89e   :  { %v1814_v50 = vpop.f32.mrf.mxu0 }
 0x8f6   :  { %v1656_v24 = vpop.xlane.xlu0 %1655 }
 0x8f7   :  { %v1689_v52 = vmax.f32 %v1656_v24, 1e-12  ;;  %vm1673_vm1 = vcmp.gt.f32.partialorder %v1656_v24, 0.0 }
 0x8f9   :  { %3036 = vrsqrt.f32 %v1689_v52 }
 0x8fa   :  { %v1652_v5 = vpop.xlane.xlu0 %1651 }
 0x8fb   :  { %v1687_v30 = vmax.f32 %v1652_v5, 1e-12  ;;  %v1658_v59 = vpop.xlane.xlu1 %1657  ;;  %vm1671_vm5 = vcmp.gt.f32.partialorder %v1652_v5, 0.0 }
 0x8fc   :  { %v1690_v62 = vmax.f32 %v1658_v59, 1e-12  ;;  %vm1674_vm4 = vcmp.gt.f32.partialorder %v1658_v59, 0.0 }
 0x8fd   :  { %3038 = vrsqrt.f32 %v1687_v30  ;;  %v2770_v30 = vpop.f32.mrf.mxu0 }
 0x8fe   :  { %3040 = vrsqrt.f32 %v1690_v62  ;;  %v1648_v58 = vpop.xlane.xlu0 %1647 }
 0x8ff   :  { %v1685_v37 = vmax.f32 %v1648_v58, 1e-12  ;;  %v1654_v23 = vpop.xlane.xlu1 %1653  ;;  %v1817_v14 = vpop.f32.mrf.mxu0  ;;  %vm1669_vm7 = vcmp.gt.f32.partialorder %v1648_v58, 0.0 }
 0x900   :  { %v1688_v18 = vmax.f32 %v1654_v23, 1e-12  ;;  %vm1672_vm6 = vcmp.gt.f32.partialorder %v1654_v23, 0.0 }
 0x901   :  { %3042 = vrsqrt.f32 %v1685_v37 }
 0x902   :  { %3044 = vrsqrt.f32 %v1688_v18  ;;  %v4384_v20 = vpop.xlane.xlu0 %1643 }
 0x903   :  { %v1683_v19 = vmax.f32 %v4384_v20, 1e-12  ;;  %v1650_v21 = vpop.xlane.xlu1 %1649  ;;  %vm1667_vm9 = vcmp.gt.f32.partialorder %v4384_v20, 0.0 }
 0x904   :  { %v1686_v7 = vmax.f32 %v1650_v21, 1e-12  ;;  %vm1670_vm8 = vcmp.gt.f32.partialorder %v1650_v21, 0.0 }
 0x905   :  { %3046 = vrsqrt.f32 %v1683_v19 }
 0x906   :  { %3048 = vrsqrt.f32 %v1686_v7  ;;  %v4387_v11 = vpop.xlane.xlu0 %1639  ;;  %v3037_v31 = vpop.eup %3036 }
 0x907   :  { %v1681_v45 = vmax.f32 %v4387_v11, 1e-12  ;;  %v4390_v13 = vpop.xlane.xlu1 %1645  ;;  %v4393_v42 = vsel %vm1673_vm1, %v3037_v31, 0.0  ;;  %vm1665_vm11 = vcmp.gt.f32.partialorder %v4387_v11, 0.0 }
 0x908   :  { %v1684_v33 = vmax.f32 %v4390_v13, 1e-12  ;;  %v1851_v24 = vmul.f32 %v2769_v28, %v4393_v42  ;;  %vm1668_vm10 = vcmp.gt.f32.partialorder %v4390_v13, 0.0 }
 0x909   :  { %3050 = vrsqrt.f32 %v1681_v45 }
 0x90a   :  { %v3039_v49 = vpop.eup %3038  ;;  %3052 = vrsqrt.f32 %v1684_v33  ;;  %v4395_v2 = vpop.xlane.xlu0 %1635 }
 0x90b   :  { %v3041_v51 = vpop.eup %3040  ;;  %v1679_v56 = vmax.f32 %v4395_v2, 1e-12  ;;  %v4398_v52 = vpop.xlane.xlu1 %1641  ;;  %v4405_v7 = vsel %vm1671_vm5, %v3039_v49, 0.0  ;;  %vm1663_vm13 = vcmp.gt.f32.partialorder %v4395_v2, 0.0 }
 0x90c   :  { %v4400_v62 = vsel %vm1674_vm4, %v3041_v51, 0.0  ;;  %v1682_v37 = vmax.f32 %v4398_v52, 1e-12  ;;  %v1849_v5 = vmul.f32 %v1814_v50, %v4405_v7  ;;  %vm1666_vm12 = vcmp.gt.f32.partialorder %v4398_v52, 0.0 }
 0x90d   :  { %v1852_v18 = vmul.f32 %v2770_v30, %v4400_v62  ;;  %3054 = vrsqrt.f32 %v1679_v56 }
 0x90e   :  { %v3043_v19 = vpop.eup %3042  ;;  %3056 = vrsqrt.f32 %v1682_v37  ;;  %v4407_v59 = vpop.xlane.xlu0 %1631 }
 0x90f   :  { %v3045_v31 = vpop.eup %3044  ;;  %v1677_v45 = vmax.f32 %v4407_v59, 1e-12  ;;  %v1638_v33 = vpop.xlane.xlu1 %1637  ;;  %v1860_v51 = vpack.c.bf16 %v1852_v18, %v1851_v24  ;;  %v4414_v30 = vsel %vm1669_vm7, %v3043_v19, 0.0  ;;  %vm1661_vm15 = vcmp.gt.f32.partialorder %v4407_v59, 0.0 }
 0x910   :  { %v4410_v15 = vsel %vm1672_vm6, %v3045_v31, 0.0  ;;  %v1680_v28 = vmax.f32 %v1638_v33, 1e-12  ;;  %v1847_v58 = vmul.f32 %v4376_v44, %v4414_v30  ;;  %vm1664_vm14 = vcmp.gt.f32.partialorder %v1638_v33, 0.0 }
 0x911   :  { %v1850_v56 = vmul.f32 %v1817_v14, %v4410_v15  ;;  %3058 = vrsqrt.f32 %v1677_v45  ;;  %2771 = vmatprep.subr.bf16.mxu0 %v1860_v51 }
 0x912   :  { %v3047_v49 = vpop.eup %3046  ;;  %3060 = vrsqrt.f32 %v1680_v28  ;;  %2772 = vmatpush3.bf16.msra.mxu0 %v1860_v51  ;;  %v1628_v23 = vpop.xlane.xlu0 %1627 }
 0x913   :  { %v3049_v37 = vpop.eup %3048  ;;  %v1675_v24 = vmax.f32 %v1628_v23, 1e-12  ;;  %v1634_v18 = vpop.xlane.xlu1 %1633  ;;  %v1859_v31 = vpack.c.bf16 %v1850_v56, %v1849_v5  ;;  %v4423_v19 = vsel %vm1667_vm9, %v3047_v49, 0.0  ;;  %vm1659_vm3 = vcmp.gt.f32.partialorder %v1628_v23, 0.0 }
 0x914   :  { %v4416_v8 = vsel %vm1670_vm8, %v3049_v37, 0.0  ;;  %v1678_v26 = vmax.f32 %v1634_v18, 1e-12  ;;  %v1845_v20 = vmul.f32 %v4378_v41, %v4423_v19  ;;  %vm1662_vm2 = vcmp.gt.f32.partialorder %v1634_v18, 0.0 }
 0x915   :  { %v1848_v14 = vmul.f32 %v4380_v57, %v4416_v8  ;;  %3062 = vrsqrt.f32 %v1675_v24  ;;  %2773 = vmatprep.subr.bf16.mxu0 %v1859_v31 }
 0x916   :  { %v3051_v50 = vpop.eup %3050  ;;  %3064 = vrsqrt.f32 %v1678_v26  ;;  %2774 = vmatpush3.bf16.msra.mxu0 %v1859_v31 }
 0x917   :  { %v3053_v21 = vpop.eup %3052  ;;  %v1630_v45 = vpop.xlane.xlu1 %1629  ;;  %v1858_v51 = vpack.c.bf16 %v1848_v14, %v1847_v58  ;;  %v4433_v26 = vsel %vm1665_vm11, %v3051_v50, 0.0 }
 0x918   :  { %v4426_v28 = vsel %vm1668_vm10, %v3053_v21, 0.0  ;;  %v1676_v44 = vmax.f32 %v1630_v45, 1e-12  ;;  %v1843_v41 = vmul.f32 %v4368_v47, %v4433_v26  ;;  %vm1660_vm1 = vcmp.gt.f32.partialorder %v1630_v45, 0.0 }
 0x919   :  { %v1846_v57 = vmul.f32 %v4382_v3, %v4426_v28  ;;  %2775 = vmatprep.subr.bf16.mxu0 %v1858_v51 }
 0x91a   :  { %v3055_v5 = vpop.eup %3054  ;;  %3066 = vrsqrt.f32 %v1676_v44  ;;  %2776 = vmatpush3.bf16.msra.mxu0 %v1858_v51 }
 0x91b   :  { %v3057_v13 = vpop.eup %3056  ;;  %v1857_v56 = vpack.c.bf16 %v1846_v57, %v1845_v20  ;;  %v4443_v37 = vsel %vm1663_vm13, %v3055_v5, 0.0  ;;  %v2870_v5 = vld [vmem:[#allocation8 + $0x18] sm:$0xff]  }
 0x91c   :  { %v4436_v49 = vsel %vm1666_vm12, %v3057_v13, 0.0  ;;  %v1841_v58 = vmul.f32 %v4370_v1, %v4443_v37 }
 0x91d   :  { %v1844_v3 = vmul.f32 %v4372_v29, %v4436_v49  ;;  %2777 = vmatprep.subr.bf16.mxu0 %v1857_v56 }
 0x91e   :  { %v3059_v11 = vpop.eup %3058  ;;  %2778 = vmatpush3.bf16.msra.mxu0 %v1857_v56 }
 0x91f   :  { %v3061_v24 = vpop.eup %3060  ;;  %v1856_v31 = vpack.c.bf16 %v1844_v3, %v1843_v41  ;;  %v1709_v2 = vsel %vm1661_vm15, %v3059_v11, 0.0 }
 0x920   :  { %v4445_v52 = vsel %vm1664_vm14, %v3061_v24, 0.0  ;;  %v1839_v33 = vmul.f32 %v4360_v48, %v1709_v2  ;;  %v4575_v48 = vpack.c.bf16 %v4317_v63, %v4303_v60 }
 0x921   :  { %v1842_v47 = vmul.f32 %v4374_v38, %v4445_v52  ;;  %2779 = vmatprep.subr.bf16.mxu0 %v1856_v31 }
 0x922   :  { %v3063_v29 = vpop.eup %3062  ;;  %2780 = vmatpush3.bf16.msra.mxu0 %v1856_v31 }
 0x923   :  { %v3065_v14 = vpop.eup %3064  ;;  %v1855_v50 = vpack.c.bf16 %v1842_v47, %v1841_v58  ;;  %v1707_v1 = vsel %vm1659_vm3, %v3063_v29, 0.0 }
 0x924   :  { %v1710_v21 = vsel %vm1662_vm2, %v3065_v14, 0.0  ;;  %v1837_v20 = vmul.f32 %v4362_v27, %v1707_v1  ;;  %v4576_v27 = vpack.c.bf16 %v4306_v53, %v4290_v39 }
 0x925   :  { %v1840_v51 = vmul.f32 %v4364_v34, %v1710_v21  ;;  %2781 = vmatprep.subr.bf16.mxu0 %v1855_v50 }
 0x926   :  { %2782 = vmatpush3.bf16.msra.mxu0 %v1855_v50 }
 0x927   :  { %v3067_v59 = vpop.eup %3066  ;;  %v1854_v44 = vpack.c.bf16 %v1840_v51, %v1839_v33 }
 0x928   :  { %v1708_v38 = vsel %vm1660_vm1, %v3067_v59, 0.0 }
 0x929   :  { %v1838_v57 = vmul.f32 %v4366_v16, %v1708_v38  ;;  %2783 = vmatprep.subr.bf16.mxu0 %v1854_v44 }
 0x92a   :  { %2784 = vmatpush3.bf16.msra.mxu0 %v1854_v44 }
 0x92b   :  { %v1853_v18 = vpack.c.bf16 %v1838_v57, %v1837_v20 }
 0x92d   :  { %2785 = vmatprep.subr.bf16.mxu0 %v1853_v18 }
 0x92e   :  { %2786 = vmatpush3.bf16.msra.mxu0 %v1853_v18 }
 0x92f   :  { %2803 = vmatprep.subr.bf16.mxu0 %v2870_v5 }
 0x931   :  { %2788 = vmatmul.mubr.bf16.vlgmr.msra.gmra.mxu0 %v1830_v40 }
 0x932   :  { %2791 = vmatprep.mubr.bf16.mxu0 %v1831_v61  ;;  %2804 = vmatpush3.bf16.msra.mxu0 %v2870_v5  ;;  %v2031_v61 = vld [vmem:[#allocation2 + $0x8] sm:$0xff] }
 0x933   :  { %v2046_v55 = vpack.c.bf16 %v2031_v61, %v2030_v6 }
 0x935   :  { %2823 = vmatprep.mubr.msk.bf16.mxu1 %vm81_vm0, %v2046_v55 }
 0x939   :  { %2792 = vmatmul.mubr.bf16.gmra.mxu0 %v1832_v43  ;;  %v2033_v43 = vld [vmem:[#allocation2 + $0x18] sm:$0xff] }
 0x93a   :  { %2795 = vmatprep.mubr.bf16.mxu0 %v4575_v48  ;;  %v2047_v4 = vpack.c.bf16 %v2033_v43, %v2032_v22 }
 0x93c   :  { %2824 = vmatmul.mubr.msk.bf16.vlgmr.msra.gmra.mxu1 %vm81_vm0, %v2047_v4 }
 0x941   :  { %2796 = vmatmul.mubr.bf16.gmra.mxu0 %v4576_v27 }
 0x942   :  { %2799 = vmatprep.mubr.bf16.mxu0 %v4577_v12 }
 0x949   :  { %2800 = vmatmul.mubr.bf16.gmra.mxu0 %v4578_v9 }
 0x9f1   :  { %v2789_v39 = vpop.f32.mrf.mxu0 }
 0x9f2   :  { %v1960_v10 = vmul.f32 %v2789_v39, %v1709_v2 }
 0x9f3   :  { %v1895_v60 = vpop.f32.mrf.mxu0 }
 0x9f4   :  { %v1984_v0 = vadd.f32 %v4482_v32, %v1960_v10  ;;  %v1958_v25 = vmul.f32 %v1895_v60, %v1707_v1 }
 0x9f5   :  { %v2790_v53 = vpop.f32.mrf.mxu0 }
 0x9f6   :  { %v2000_v63 = vmax.f32 %v1984_v0, 0.0  ;;  %v1982_v40 = vadd.f32 %v4482_v32, %v1958_v25  ;;  %v1961_v34 = vmul.f32 %v2790_v53, %v1710_v21 }
 0x9f7   :  { %v1898_v16 = vpop.f32.mrf.mxu0 }
 0x9f8   :  { %2016 = vst.msk [vmem:[#allocation2 + $0x30] sm:$0xff] %vm81_vm0, %v2000_v63  ;;  %v1998_v23 = vmax.f32 %v1982_v40, 0.0  ;;  %v1985_v45 = vadd.f32 %v4482_v32, %v1961_v34  ;;  %v1959_v13 = vmul.f32 %v1898_v16, %v1708_v38 }
 0x9f9   :  { %v2793_v56 = vpop.f32.mrf.mxu0 }
 0x9fa   :  { %2014 = vst.msk [vmem:[#allocation2 + $0x20] sm:$0xff] %vm81_vm0, %v1998_v23  ;;  %v2001_v41 = vmax.f32 %v1985_v45, 0.0  ;;  %v1983_v3 = vadd.f32 %v4482_v32, %v1959_v13  ;;  %v1964_v11 = vmul.f32 %v2793_v56, %v4433_v26 }
 0x9fb   :  { %v1911_v24 = vpop.f32.mrf.mxu0 }
 0x9fc   :  { %2017 = vst.msk [vmem:[#allocation2 + $0x38] sm:$0xff] %vm81_vm0, %v2001_v41  ;;  %v1999_v31 = vmax.f32 %v1983_v3, 0.0  ;;  %v1988_v58 = vadd.f32 %v4482_v32, %v1964_v11  ;;  %v1962_v47 = vmul.f32 %v1911_v24, %v4443_v37 }
 0x9fd   :  { %v2794_v29 = vpop.f32.mrf.mxu0 }
 0x9fe   :  { %2015 = vst.msk [vmem:[#allocation2 + $0x28] sm:$0xff] %vm81_vm0, %v1999_v31  ;;  %v2004_v2 = vmax.f32 %v1988_v58, 0.0  ;;  %v1986_v14 = vadd.f32 %v4482_v32, %v1962_v47  ;;  %v1965_v50 = vmul.f32 %v2794_v29, %v4436_v49 }
 0x9ff   :  { %v1914_v21 = vpop.f32.mrf.mxu0  ;;  %v2036_v6 = vld [vmem:[#allocation2 + $0x30] sm:$0xff] }
 0xa00   :  { %2020 = vst.msk [vmem:[#allocation2 + $0x50] sm:$0xff] %vm81_vm0, %v2004_v2  ;;  %v2002_v26 = vmax.f32 %v1986_v14, 0.0  ;;  %v1989_v33 = vadd.f32 %v4482_v32, %v1965_v50  ;;  %v1963_v51 = vmul.f32 %v1914_v21, %v4445_v52 }
 0xa01   :  { %v2797_v1 = vpop.f32.mrf.mxu0  ;;  %v2034_v48 = vld [vmem:[#allocation2 + $0x20] sm:$0xff] }
 0xa02   :  { %2018 = vst.msk [vmem:[#allocation2 + $0x40] sm:$0xff] %vm81_vm0, %v2002_v26  ;;  %v2005_v37 = vmax.f32 %v1989_v33, 0.0  ;;  %v1987_v59 = vadd.f32 %v4482_v32, %v1963_v51  ;;  %v1968_v44 = vmul.f32 %v2797_v1, %v4414_v30  ;;  %v2825_v1 = vpop.f32.mrf.mxu1 }
 0xa03   :  { %v1927_v38 = vpop.f32.mrf.mxu0  ;;  %v2037_v18 = vld [vmem:[#allocation2 + $0x38] sm:$0xff] }
 0xa04   :  { %2021 = vst.msk [vmem:[#allocation2 + $0x58] sm:$0xff] %vm81_vm0, %v2005_v37  ;;  %v2003_v49 = vmax.f32 %v1987_v59, 0.0  ;;  %v1992_v20 = vadd.f32 %v4482_v32, %v1968_v44  ;;  %v1966_v57 = vmul.f32 %v1927_v38, %v4423_v19  ;;  %v2049_v55 = vpack.c.bf16 %v2037_v18, %v2036_v6  ;;  %v2225_v37 = vpop.f32.mrf.mxu1 }
 0xa05   :  { %v2798_v5 = vpop.f32.mrf.mxu0  ;;  %v2035_v52 = vld [vmem:[#allocation2 + $0x28] sm:$0xff] }
 0xa06   :  { %2019 = vst.msk [vmem:[#allocation2 + $0x48] sm:$0xff] %vm81_vm0, %v2003_v49  ;;  %v2008_v27 = vmax.f32 %v1992_v20, 0.0  ;;  %v1990_v12 = vadd.f32 %v4482_v32, %v1966_v57  ;;  %v1969_v9 = vmul.f32 %v2798_v5, %v4416_v8  ;;  %v2048_v30 = vpack.c.bf16 %v2035_v52, %v2034_v48  ;;  %v2826_v59 = vpop.f32.mrf.mxu1 }
 0xa07   :  { %v1930_v61 = vpop.f32.mrf.mxu0  ;;  %v2040_v13 = vld [vmem:[#allocation2 + $0x50] sm:$0xff] }
 0xa08   :  { %2024 = vst.msk [vmem:[#allocation2 + $0x70] sm:$0xff] %vm81_vm0, %v2008_v27  ;;  %v2006_v22 = vmax.f32 %v1990_v12, 0.0  ;;  %v1993_v19 = vadd.f32 %v4482_v32, %v1969_v9  ;;  %v1967_v43 = vmul.f32 %v1930_v61, %v4426_v28  ;;  %2805 = vmatprep.mubr.msk.bf16.mxu0 %vm81_vm0, %v2048_v30  ;;  %2827 = vmatprep.mubr.msk.bf16.mxu1 %vm81_vm0, %v2048_v30  ;;  %v2227_v44 = vpop.f32.mrf.mxu1 }
 0xa09   :  { %v2801_v4 = vpop.f32.mrf.mxu0  ;;  %2806 = vmatmul.mubr.msk.bf16.vlgmr.msra.gmra.mxu0 %vm81_vm0, %v2049_v55  ;;  %2828 = vmatmul.mubr.msk.bf16.gmra.mxu1 %vm81_vm0, %v2049_v55  ;;  %v2038_v40 = vld [vmem:[#allocation2 + $0x40] sm:$0xff] }
 0xa0a   :  { %2022 = vst.msk [vmem:[#allocation2 + $0x60] sm:$0xff] %vm81_vm0, %v2006_v22  ;;  %v2009_v8 = vmax.f32 %v1993_v19, 0.0  ;;  %v1991_v39 = vadd.f32 %v4482_v32, %v1967_v43  ;;  %v1972_v10 = vmul.f32 %v2801_v4, %v4393_v42 }
 0xa0b   :  { %v1943_v60 = vpop.f32.mrf.mxu0  ;;  %v2041_v53 = vld [vmem:[#allocation2 + $0x58] sm:$0xff] }
 0xa0c   :  { %2025 = vst.msk [vmem:[#allocation2 + $0x78] sm:$0xff] %vm81_vm0, %v2009_v8  ;;  %v2007_v28 = vmax.f32 %v1991_v39, 0.0  ;;  %v1996_v0 = vadd.f32 %v4482_v32, %v1972_v10  ;;  %v1970_v25 = vmul.f32 %v1943_v60, %v4405_v7  ;;  %v2051_v41 = vpack.c.bf16 %v2041_v53, %v2040_v13 }
 0xa0d   :  { %v2802_v63 = vpop.f32.mrf.mxu0  ;;  %v2039_v34 = vld [vmem:[#allocation2 + $0x48] sm:$0xff] }
 0xa0e   :  { %2023 = vst.msk [vmem:[#allocation2 + $0x68] sm:$0xff] %vm81_vm0, %v2007_v28  ;;  %v2012_v16 = vmax.f32 %v1996_v0, 0.0  ;;  %v1994_v23 = vadd.f32 %v4482_v32, %v1970_v25  ;;  %v1973_v45 = vmul.f32 %v2802_v63, %v4400_v62  ;;  %v2050_v42 = vpack.c.bf16 %v2039_v34, %v2038_v40  ;;  %v2465_v25 = vld [vmem:[%s4570_s7 + $0x1] ss:$0 sm:$0xff]  ;;  %s3212_s7 = smov [#allocation9]  }
 0xa0f   :  { %v1946_v56 = vpop.f32.mrf.mxu0  ;;  %v2044_v2 = vld [vmem:[#allocation2 + $0x70] sm:$0xff]  ;;  %s2372_s3 = sshll.u32 %s3212_s7, 4  ;;  %s2373_s3 = int_to_ptr.vmem [resolvable:$true] %s2372_s3 }
 0xa10   :  { %2028 = vst.msk [vmem:[#allocation2 + $0x90] sm:$0xff] %vm81_vm0, %v2012_v16  ;;  %v2010_v3 = vmax.f32 %v1994_v23, 0.0  ;;  %v1997_v7 = vadd.f32 %v4482_v32, %v1973_v45  ;;  %v1971_v11 = vmul.f32 %v1946_v56, %v4410_v15  ;;  %2809 = vmatprep.mubr.msk.bf16.mxu0 %vm81_vm0, %v2050_v42  ;;  %2831 = vmatprep.mubr.msk.bf16.mxu1 %vm81_vm0, %v2050_v42  ;;  %s3177_s12 = scalar_lea.vmem %s2373_s3, 256  ;;  %p3182_p2 = scmp.lt.s32.totalorder %s2373_s3, %s2373_s3 }
 0xa11   :  { %2810 = vmatmul.mubr.msk.bf16.gmra.mxu0 %vm81_vm0, %v2051_v41  ;;  %2832 = vmatmul.mubr.msk.bf16.gmra.mxu1 %vm81_vm0, %v2051_v41  ;;  %v2042_v47 = vld [vmem:[#allocation2 + $0x60] sm:$0xff]  ;;  %p3178_p1 = scmp.ne.s32.totalorder %s2373_s3, %s3177_s12  ;;  %p3183_p3 = scmp.lt.s32.totalorder %s3177_s12, %s3177_s12 }
 0xa12   :  { %2026 = vst.msk [vmem:[#allocation2 + $0x80] sm:$0xff] %vm81_vm0, %v2010_v3  ;;  %v2013_v62 = vmax.f32 %v1997_v7, 0.0  ;;  %v1995_v24 = vadd.f32 %v4482_v32, %v1971_v11 }
 0xa13   :  { %v2045_v58 = vld [vmem:[#allocation2 + $0x78] sm:$0xff]  ;;  %p3184_p4 = por %p3183_p3, %p3182_p2 }
 0xa14   :  { %2029 = vst.msk [vmem:[#allocation2 + $0x98] sm:$0xff] %vm81_vm0, %v2013_v62  ;;  %v2011_v31 = vmax.f32 %v1995_v24, 0.0  ;;  %v2053_v14 = vpack.c.bf16 %v2045_v58, %v2044_v2 }
 0xa15   :  { %v2043_v29 = vld [vmem:[#allocation2 + $0x68] sm:$0xff]  ;;  %p3185_p5 = pnand %p3184_p4, %p3178_p1 }
 0xa16   :  { %2027 = vst.msk [vmem:[#allocation2 + $0x88] sm:$0xff] %vm81_vm0, %v2011_v31  ;;  %v2052_v15 = vpack.c.bf16 %v2043_v29, %v2042_v47  ;;  %v2317_v29 = vpop.xlane.xlu0 %2316 }
 0xa17   :  { %v2059_v33 = vld [vmem:[#allocation2 + $0x90] sm:$0xff] }
 0xa18   :  { %2813 = vmatprep.mubr.msk.bf16.mxu0 %vm81_vm0, %v2052_v15  ;;  %2835 = vmatprep.mubr.msk.bf16.mxu1 %vm81_vm0, %v2052_v15  ;;  %v2320_v15 = vpop.xlane.xlu1 %2319 }
 0xa19   :  { %2814 = vmatmul.mubr.msk.bf16.gmra.mxu0 %vm81_vm0, %v2053_v14  ;;  %2836 = vmatmul.mubr.msk.bf16.gmra.mxu1 %vm81_vm0, %v2053_v14  ;;  %v2057_v50 = vld [vmem:[#allocation2 + $0x80] sm:$0xff] }
 0xa1b   :  { %v2060_v32 = vld [vmem:[#allocation2 + $0x98] sm:$0xff] }
 0xa1c   :  { %v2062_v51 = vpack.c.bf16 %v2060_v32, %v2059_v33 }
 0xa1d   :  { %v2058_v21 = vld [vmem:[#allocation2 + $0x88] sm:$0xff] }
 0xa1e   :  { %v2061_v26 = vpack.c.bf16 %v2058_v21, %v2057_v50 }
 0xa20   :  { %2817 = vmatprep.mubr.msk.bf16.mxu0 %vm81_vm0, %v2061_v26 }
 0xa21   :  { %2818 = vmatmul.mubr.msk.bf16.gmra.mxu0 %vm81_vm0, %v2062_v51 }
 0xac9   :  { %v2807_v38 = vpop.f32.mrf.mxu0  ;;  %v2829_v49 = vpop.f32.mrf.mxu1 }
 0xacb   :  { %v2130_v20 = vpop.f32.mrf.mxu0  ;;  %v2237_v57 = vpop.f32.mrf.mxu1 }
 0xacd   :  { %v2808_v18 = vpop.f32.mrf.mxu0  ;;  %v2830_v5 = vpop.f32.mrf.mxu1 }
 0xacf   :  { %v2132_v48 = vpop.f32.mrf.mxu0  ;;  %v2239_v52 = vpop.f32.mrf.mxu1 }
 0xad1   :  { %v2811_v27 = vpop.f32.mrf.mxu0  ;;  %v2833_v12 = vpop.f32.mrf.mxu1 }
 0xad3   :  { %v2142_v9 = vpop.f32.mrf.mxu0  ;;  %v2249_v30 = vpop.f32.mrf.mxu1 }
 0xad5   :  { %v2812_v6 = vpop.f32.mrf.mxu0  ;;  %v2834_v61 = vpop.f32.mrf.mxu1 }
 0xad7   :  { %v2144_v55 = vpop.f32.mrf.mxu0  ;;  %v2251_v22 = vpop.f32.mrf.mxu1 }
 0xad9   :  { %v2815_v19 = vpop.f32.mrf.mxu0  ;;  %v2837_v43 = vpop.f32.mrf.mxu1 }
 0xadb   :  { %v2154_v4 = vpop.f32.mrf.mxu0  ;;  %v2261_v8 = vpop.f32.mrf.mxu1 }
 0xadd   :  { %v2816_v39 = vpop.f32.mrf.mxu0  ;;  %v2838_v10 = vpop.f32.mrf.mxu1 }
 0xadf   :  { %v2156_v60 = vpop.f32.mrf.mxu0  ;;  %v2263_v28 = vpop.f32.mrf.mxu1 }
 0xae1   :  { %v2819_v0 = vpop.f32.mrf.mxu0 }
 0xae2   :  { %v2268_v53 = vadd.f32 %v2837_v43, %v2819_v0 }
 0xae3   :  { %v2166_v63 = vpop.f32.mrf.mxu0 }
 0xae4   :  { %v2282_v40 = vadd.f32 %v2465_v25, %v2268_v53 }
 0xae5   :  { %v2820_v34 = vpop.f32.mrf.mxu0 }
 0xae6   :  { %v2284_v16 = vmax.f32 %v2282_v40, 0.0  ;;  %v2271_v23 = vadd.f32 %v2838_v10, %v2820_v34 }
 0xae7   :  { %v2168_v45 = vpop.f32.mrf.mxu0 }
 0xae8   :  { %v2321_v42 = vmul.f32 %v4269_v54, %v2284_v16  ;;  %v2283_v13 = vadd.f32 %v2465_v25, %v2271_v23 }
 0xaea   :  { %v2323_v56 = vadd.f32 %v4283_v36, %v2321_v42  ;;  %v2285_v41 = vmax.f32 %v2283_v13, 0.0 }
 0xaec   :  { %3068 = vtanh.f32 %v2323_v56  ;;  %v2322_v3 = vmul.f32 %v4269_v54, %v2285_v41 }
 0xaee   :  { %v2324_v7 = vadd.f32 %v4283_v36, %v2322_v3 }
 0xaf0   :  { %3070 = vtanh.f32 %v2324_v7 }
 0xaf9   :  { %v3069_v11 = vpop.eup %3068 }
 0xafa   :  { %v2327_v62 = vmul.f32 %v3069_v11, %v4343_v17 }
 0xafc   :  { %v2329_v24 = vsel %vm81_vm0, %v2327_v62, 0.0 }
 0xafd   :  { %v3071_v31 = vpop.eup %3070  ;;  %2330 = vadd.xlane.f32.xlu0 %v2329_v24 }
 0xafe   :  { %v2328_v58 = vmul.f32 %v3071_v31, %v4343_v17 }
 0xb00   :  { %v2332_v47 = vsel %vm81_vm0, %v2328_v58, 0.0 }
 0xb01   :  { %2333 = vadd.xlane.f32.xlu1 %v2332_v47 }
 0xb86   :  { %v2331_v2 = vpop.xlane.xlu0 %2330 }
 0xb87   :  { %v2335_v14 = vmax.f32 %v2317_v29, %v2331_v2 }
 0xb89   :  { %v2337_v54 = vsub.f32 %v2317_v29, %v2335_v14  ;;  %v2343_v32 = vsub.f32 %v2331_v2, %v2335_v14 }
 0xb8a   :  { %v2334_v36 = vpop.xlane.xlu1 %2333 }
 0xb8b   :  { %v2339_v50 = vmul.f32 1.442695, %v2337_v54  ;;  %v2345_v21 = vmul.f32 1.442695, %v2343_v32  ;;  %v2336_v26 = vmax.f32 %v2320_v15, %v2334_v36 }
 0xb8d   :  { %3072 = vpow2.f32 %v2339_v50  ;;  %v2338_v33 = vsub.f32 %v2320_v15, %v2336_v26  ;;  %v2344_v51 = vsub.f32 %v2334_v36, %v2336_v26 }
 0xb8e   :  { %3074 = vpow2.f32 %v2345_v21 }
 0xb8f   :  { %v2341_v1 = vmul.f32 1.442695, %v2338_v33  ;;  %v2347_v37 = vmul.f32 1.442695, %v2344_v51 }
 0xb91   :  { %3076 = vpow2.f32 %v2341_v1 }
 0xb92   :  { %3078 = vpow2.f32 %v2347_v37 }
 0xb9a   :  { %v3073_v17 = vpop.eup %3072 }
 0xb9b   :  { %v3075_v59 = vpop.eup %3074 }
 0xb9c   :  { %v2349_v44 = vadd.f32 %v3075_v59, %v3073_v17 }
 0xb9e   :  { %v3077_v38 = vpop.eup %3076  ;;  %3080 = vrcp.f32 %v2349_v44 }
 0xb9f   :  { %v3079_v49 = vpop.eup %3078 }
 0xba0   :  { %v2350_v20 = vadd.f32 %v3079_v49, %v3077_v38 }
 0xba2   :  { %3082 = vrcp.f32 %v2350_v20 }
 0xbab   :  { %v3081_v57 = vpop.eup %3080 }
 0xbac   :  { %v2355_v18 = vmul.f32 %v3081_v57, %v3073_v17  ;;  %v2359_v5 = vmul.f32 %v3081_v57, %v3075_v59 }
 0xbae   :  { %v2357_v48 = vmul.f32 %v2355_v18, %v3924_v46  ;;  %v2361_v52 = vmul.f32 %v2359_v5, %v2284_v16 }
 0xbaf   :  { %v3083_v27 = vpop.eup %3082 }
 0xbb0   :  { %v2356_v12 = vmul.f32 %v3083_v27, %v3077_v38  ;;  %v2360_v9 = vmul.f32 %v3083_v27, %v3079_v49  ;;  %v2363_v30 = vadd.f32 %v2361_v52, %v2357_v48 }
 0xbb2   :  { %v2358_v6 = vmul.f32 %v2356_v12, %v3931_v35  ;;  %v2362_v61 = vmul.f32 %v2360_v9, %v2285_v41  ;;  %2365 = vst.msk [vmem:[#allocation9] sm:$0xff] %vm81_vm0, %v2363_v30 }
 0xbb4   :  { %v2364_v55 = vadd.f32 %v2362_v61, %v2358_v6 }
 0xbb6   :  { %2366 = vst.msk [vmem:[#allocation9 + $0x8] sm:$0xff] %vm81_vm0, %v2364_v55 }
 0xbb7   :  { %3188 = shalt.err (!%p3185_p5)
}
 0xbb8   :  { %2378 = dma.vmem_to_hbm [thread:$0]  %s2373_s3, 256, %s4574_s11, [#allocation5], %s3207_s27, %s3207_s27, %s3208_s28  }
 0xbb9   :  { %3201 = dma.done.wait [#allocation5], 256  }
 0xbba   :  { %3202 = vsyncadd [#allocation5], 4294967040 }
 0xbbb   :  { %2382 = vsyncpa [#allocation4], 1 }
 0xbbc   :  { %2383 = vsyncpa [#allocation7], 1 }
 0xbbd   :  { %2384 = vsyncpa [#allocation5], 1 }

</bundles_post_ra>
